<compile_context>
chip_gen: v7x
topology: tpu7x:2x2x1
jax: 0.10.0
libtpu: 0.0.40
codegen_flags: <defaults>
</compile_context>

<pallas_src>
import jax
import jax.numpy as jnp
from jax import lax
from jax.experimental import pallas as pl
from jax.experimental.pallas import tpu as pltpu


# ----------------------------------------------------------------------------
# Fused decoder kernel factory.
# ----------------------------------------------------------------------------
def _make_decoder_kernel(S, B_pad, E, H, L, V, O_pad):
    """Kernel refs (in order):
       ids (S*B_pad,1) i32, emb_table (V,E),
       h0 (L,B_pad,H), c0 (L,B_pad,H),
       [w_ih_t (in,4H), w_hh_t (H,4H), bias (1,4H)] * L   (gate order i,f,o,g),
       dense_w (H,O_pad), dense_b (1,O_pad),
       -> fc (S*B_pad,O_pad), h_out (L,B_pad,H), c_out (L,B_pad,H)
       scratch: xproj (S*B_pad,4H) VMEM, seq (S*B_pad,H) VMEM.
    """

    def kernel(*refs):
        it = iter(refs)
        ids_ref = next(it)
        tab_ref = next(it)
        h0_ref = next(it)
        c0_ref = next(it)
        layer_refs = [(next(it), next(it), next(it)) for _ in range(L)]
        dw_ref = next(it)
        db_ref = next(it)
        fc_ref = next(it)
        hN_ref = next(it)
        cN_ref = next(it)
        xproj_ref = next(it)
        seq_ref = next(it)

        f32 = jnp.float32

        # -------- embedding lookup as a one-hot MXU matmul (tiny vocab) -------
        ids = ids_ref[...]                                          # (S*B_pad, 1)
        onehot = (ids == lax.broadcasted_iota(jnp.int32, (S * B_pad, V), 1)
                  ).astype(f32)                                     # (S*B_pad, V)
        emb = jnp.dot(onehot, tab_ref[...],
                      preferred_element_type=f32)                   # (S*B_pad, E)

        # ---- layer-0 input projection hoisted off the recurrence, bias folded
        w_ih0_ref, _, b0_ref = layer_refs[0]
        xproj_ref[...] = (jnp.dot(emb, w_ih0_ref[...],
                                  preferred_element_type=f32) + b0_ref[...])

        # Weights held in vregs across the wavefront (tiny at these sizes).
        wih = [None] + [layer_refs[l][0][...] for l in range(1, L)]   # (H, 4H)
        whh = [layer_refs[l][1][...] for l in range(L)]               # (H, 4H)
        bias = [None] + [layer_refs[l][2][...] for l in range(1, L)]  # (1, 4H)

        hs = [h0_ref[l] for l in range(L)]                            # (B_pad, H)
        cs = [c0_ref[l] for l in range(L)]

        # -------- wavefront over anti-diagonals of the (L, S) recurrence grid --
        # Layers processed in DECREASING order within a diagonal so that hs[l-1]
        # still holds layer l-1's output at exactly the timestep layer l needs.
        for d in range(S + L - 1):
            for l in range(L - 1, -1, -1):
                t = d - l
                if not (0 <= t < S):
                    continue
                if l == 0:
                    # bias already folded into the hoisted projection
                    gates = (xproj_ref[t * B_pad:(t + 1) * B_pad, :]
                             + jnp.dot(hs[0], whh[0], preferred_element_type=f32))
                else:
                    gates = (jnp.dot(hs[l - 1], wih[l], preferred_element_type=f32)
                             + jnp.dot(hs[l], whh[l], preferred_element_type=f32)
                             + bias[l])
                # gate order [i, f, o, g]: contiguous sigmoid span + tanh span
                sig = jax.nn.sigmoid(gates[:, :3 * H])                # (B_pad, 3H)
                g_g = jnp.tanh(gates[:, 3 * H:])                      # (B_pad, H)
                i_g = sig[:, 0 * H:1 * H]
                f_g = sig[:, 1 * H:2 * H]
                o_g = sig[:, 2 * H:3 * H]
                c_new = f_g * cs[l] + i_g * g_g
                h_new = o_g * jnp.tanh(c_new)
                cs[l] = c_new
                hs[l] = h_new
                if l == L - 1:
                    # 8-sublane aligned, unmasked store into the VMEM scratch
                    seq_ref[t * B_pad:(t + 1) * B_pad, :] = h_new

        for l in range(L):
            hN_ref[l] = hs[l]
            cN_ref[l] = cs[l]

        # ----------------- dense + ReLU (lane-dense padded slab) ---------------
        y = jnp.dot(seq_ref[...], dw_ref[...],
                    preferred_element_type=f32) + db_ref[...]
        fc_ref[...] = jnp.maximum(y, 0.0)                             # (S*B_pad, O_pad)

    return kernel


# ----------------------------------------------------------------------------
# Full Decoder forward (one pallas_call).
# ----------------------------------------------------------------------------
def decoder_forward(params, x_ids, hidden, cell):
    """
    x_ids : (seq, batch) int32 token ids
    hidden, cell : (num_layers, batch, hidden_dim) float32
    returns (fc, hidden_out, cell_out):
            (seq, batch, out_dim), (L, B, H), (L, B, H)
    """
    emb_table = params["embedding"]                  # (V, E)
    V, E = emb_table.shape
    S, B = x_ids.shape
    L, _, H = hidden.shape
    dw = params["dense_w_pad_t"]                     # (H, O_pad)
    db = params["dense_b_pad"]                       # (1, O_pad)
    O_pad = dw.shape[1]
    O = params["output_dim"]
    B_pad = ((B + 7) // 8) * 8                       # pad batch to 8 sublanes

    ids_pad = jnp.zeros((S, B_pad), jnp.int32).at[:, :B].set(x_ids)
    ids_pad = ids_pad.reshape(S * B_pad, 1)
    h0 = jnp.zeros((L, B_pad, H), jnp.float32).at[:, :B, :].set(hidden)
    c0 = jnp.zeros((L, B_pad, H), jnp.float32).at[:, :B, :].set(cell)

    inputs = [ids_pad, emb_table, h0, c0]
    in_specs = [
        pl.BlockSpec((S * B_pad, 1), lambda: (0, 0)),
        pl.BlockSpec((V, E), lambda: (0, 0)),
        pl.BlockSpec((L, B_pad, H), lambda: (0, 0, 0)),
        pl.BlockSpec((L, B_pad, H), lambda: (0, 0, 0)),
    ]
    for lp in params["lstm"]:
        w_ih, w_hh, b = lp["w_ih_t_k"], lp["w_hh_t_k"], lp["bias_k"]
        inputs += [w_ih, w_hh, b]
        in_specs += [
            pl.BlockSpec(w_ih.shape, lambda: (0, 0)),
            pl.BlockSpec(w_hh.shape, lambda: (0, 0)),
            pl.BlockSpec(b.shape, lambda: (0, 0)),
        ]
    inputs += [dw, db]
    in_specs += [
        pl.BlockSpec(dw.shape, lambda: (0, 0)),
        pl.BlockSpec(db.shape, lambda: (0, 0)),
    ]

    out_shape = (
        jax.ShapeDtypeStruct((S * B_pad, O_pad), jnp.float32),   # lane-dense fc slab
        jax.ShapeDtypeStruct((L, B_pad, H), jnp.float32),        # final h (padded B)
        jax.ShapeDtypeStruct((L, B_pad, H), jnp.float32),        # final c (padded B)
    )
    out_specs = (
        pl.BlockSpec((S * B_pad, O_pad), lambda: (0, 0)),
        pl.BlockSpec((L, B_pad, H), lambda: (0, 0, 0)),
        pl.BlockSpec((L, B_pad, H), lambda: (0, 0, 0)),
    )

    kernel = _make_decoder_kernel(S, B_pad, E, H, L, V, O_pad)
    fc_pad, h_pad, c_pad = pl.pallas_call(
        kernel,
        out_shape=out_shape,
        in_specs=in_specs,
        out_specs=out_specs,
        scratch_shapes=[
            pltpu.VMEM((S * B_pad, 4 * H), jnp.float32),   # hoisted layer-0 xproj
            pltpu.VMEM((S * B_pad, H), jnp.float32),       # last-layer sequence
        ],
    )(*inputs)

    fc = fc_pad.reshape(S, B_pad, O_pad)[:, :B, :O]
    return fc, h_pad[:, :B, :], c_pad[:, :B, :]


# ----------------------------------------------------------------------------
# Pure-JAX reference (matches PyTorch nn.LSTM semantics) for validation.
# ----------------------------------------------------------------------------
def decoder_reference(params, x_ids, hidden, cell):
    P = jax.lax.Precision.HIGHEST
    emb = jnp.take(params["embedding"], x_ids, axis=0)            # (S, B, E)
    H = hidden.shape[-1]
    O = params["output_dim"]
    layer_in = emb
    h_fin, c_fin = [], []
    for l, lp in enumerate(params["lstm"]):
        w_ih_t, w_hh_t, b = lp["w_ih_t"], lp["w_hh_t"], lp["bias"]

        def step(carry, x_t, w_ih_t=w_ih_t, w_hh_t=w_hh_t, b=b):
            h, c = carry
            gates = (jnp.dot(x_t, w_ih_t, precision=P)
                     + jnp.dot(h, w_hh_t, precision=P) + b)
            i = jax.nn.sigmoid(gates[:, 0 * H:1 * H])
            f = jax.nn.sigmoid(gates[:, 1 * H:2 * H])
            g = jnp.tanh(gates[:, 2 * H:3 * H])
            o = jax.nn.sigmoid(gates[:, 3 * H:4 * H])
            c = f * c + i * g
            h = o * jnp.tanh(c)
            return (h, c), h

        (hN, cN), outs = lax.scan(step, (hidden[l], cell[l]), layer_in)
        layer_in = outs
        h_fin.append(hN)
        c_fin.append(cN)

    w = params["dense_w_pad_t"][:, :O]
    bb = params["dense_b_pad"][0, :O]
    fc = jnp.maximum(jnp.einsum("sbh,ho->sbo", layer_in, w, precision=P) + bb, 0.0)
    return fc, jnp.stack(h_fin, axis=0), jnp.stack(c_fin, axis=0)


# ----------------------------------------------------------------------------
# Deterministic parameter construction (PyTorch-equivalent shapes).
# ----------------------------------------------------------------------------
def _reorder_gate_rows(w):
    """Permute the leading 4H axis from PyTorch gate order [i,f,g,o] to [i,f,o,g]."""
    Hh = w.shape[0] // 4
    return jnp.concatenate([w[:2 * Hh], w[3 * Hh:], w[2 * Hh:3 * Hh]], axis=0)


def make_params(key, embedding_dim, input_dim, hidden_dim, output_dim, num_layers):
    ks = jax.random.split(key, 2 + 4 * num_layers + 2)
    ki = iter(ks)
    scale = 1.0 / jnp.sqrt(hidden_dim)

    params = {"output_dim": output_dim}
    params["embedding"] = jax.random.normal(
        next(ki), (input_dim, embedding_dim), jnp.float32)

    lstm_params = []
    for l in range(num_layers):
        in_dim = embedding_dim if l == 0 else hidden_dim
        w_ih = scale * jax.random.normal(next(ki), (4 * hidden_dim, in_dim))
        w_hh = scale * jax.random.normal(next(ki), (4 * hidden_dim, hidden_dim))
        b_ih = scale * jax.random.normal(next(ki), (4 * hidden_dim,))
        b_hh = scale * jax.random.normal(next(ki), (4 * hidden_dim,))
        bias = b_ih + b_hh
        lstm_params.append({
            # PyTorch gate order [i,f,g,o] -- used by the reference.
            "w_ih_t": jnp.asarray(w_ih.T, jnp.float32),                     # (in, 4H)
            "w_hh_t": jnp.asarray(w_hh.T, jnp.float32),                     # (H, 4H)
            "bias": jnp.asarray(bias[None, :], jnp.float32),                # (1, 4H)
            # Kernel gate order [i,f,o,g]: contiguous sigmoid span + tanh span.
            "w_ih_t_k": jnp.asarray(_reorder_gate_rows(w_ih).T, jnp.float32),
            "w_hh_t_k": jnp.asarray(_reorder_gate_rows(w_hh).T, jnp.float32),
            "bias_k": jnp.asarray(_reorder_gate_rows(bias)[None, :], jnp.float32),
        })
    params["lstm"] = lstm_params

    dense_w = scale * jax.random.normal(next(ki), (output_dim, hidden_dim))
    dense_b = scale * jax.random.normal(next(ki), (output_dim,))
    # Pad the output dim to a multiple of 128 for a lane-dense store in-kernel.
    o_pad = ((output_dim + 127) // 128) * 128
    dw_pad = jnp.zeros((hidden_dim, o_pad), jnp.float32)
    dw_pad = dw_pad.at[:, :output_dim].set(jnp.asarray(dense_w.T, jnp.float32))
    db_pad = jnp.zeros((1, o_pad), jnp.float32)
    db_pad = db_pad.at[0, :output_dim].set(jnp.asarray(dense_b, jnp.float32))
    params["dense_w_pad_t"] = dw_pad                                   # (H, O_pad)
    params["dense_b_pad"] = db_pad                                     # (1, O_pad)
    return params


if __name__ == "__main__":
    EMBEDDING_DIM = 16
    INPUT_DIM = 32        # vocab size
    HIDDEN_DIM = 32
    OUTPUT_DIM = 24
    NUM_LAYERS = 2
    SEQ, BATCH = 8, 2

    key = jax.random.PRNGKey(0)
    kp, kx, kh, kc = jax.random.split(key, 4)

    params = make_params(kp, EMBEDDING_DIM, INPUT_DIM, HIDDEN_DIM,
                         OUTPUT_DIM, NUM_LAYERS)

    x = jax.random.randint(kx, (SEQ, BATCH), 0, INPUT_DIM, dtype=jnp.int32)
    hidden = jax.random.normal(kh, (NUM_LAYERS, BATCH, HIDDEN_DIM), jnp.float32)
    cell = jax.random.normal(kc, (NUM_LAYERS, BATCH, HIDDEN_DIM), jnp.float32)

    fc, h_out, c_out = decoder_forward(params, x, hidden, cell)
    jax.block_until_ready((fc, h_out, c_out))

    assert fc.shape == (SEQ, BATCH, OUTPUT_DIM)
    assert h_out.shape == (NUM_LAYERS, BATCH, HIDDEN_DIM)
    assert c_out.shape == (NUM_LAYERS, BATCH, HIDDEN_DIM)

    # Validate against a pure-JAX reference of the same PyTorch semantics.
    fc_ref, h_ref, c_ref = decoder_reference(params, x, hidden, cell)
    assert jnp.allclose(fc, fc_ref, atol=2e-3, rtol=2e-3)
    assert jnp.allclose(h_out, h_ref, atol=2e-3, rtol=2e-3)
    assert jnp.allclose(c_out, c_ref, atol=2e-3, rtol=2e-3)

    print("KERNEL_OK")
</pallas_src>

<mosaic_0001>
module attributes {stable_mosaic.version = 11 : i64} {
  func.func @kernel(%arg0: memref<64x1xi32, #tpu.memory_space<vmem>>, %arg1: memref<32x16xf32, #tpu.memory_space<vmem>>, %arg2: memref<2x8x32xf32, #tpu.memory_space<vmem>>, %arg3: memref<2x8x32xf32, #tpu.memory_space<vmem>>, %arg4: memref<16x128xf32, #tpu.memory_space<vmem>>, %arg5: memref<32x128xf32, #tpu.memory_space<vmem>>, %arg6: memref<1x128xf32, #tpu.memory_space<vmem>>, %arg7: memref<32x128xf32, #tpu.memory_space<vmem>>, %arg8: memref<32x128xf32, #tpu.memory_space<vmem>>, %arg9: memref<1x128xf32, #tpu.memory_space<vmem>>, %arg10: memref<32x128xf32, #tpu.memory_space<vmem>>, %arg11: memref<1x128xf32, #tpu.memory_space<vmem>>, %arg12: memref<64x128xf32, #tpu.memory_space<vmem>>, %arg13: memref<2x8x32xf32, #tpu.memory_space<vmem>>, %arg14: memref<2x8x32xf32, #tpu.memory_space<vmem>>, %arg15: memref<64x128xf32, #tpu.memory_space<vmem>>, %arg16: memref<64x32xf32, #tpu.memory_space<vmem>>) attributes {dimension_semantics = [], scalar_prefetch = 0 : i64, scratch_operands = 2 : i64, tpu.core_type = #tpu.core_type<tc>} {
    %c0 = arith.constant 0 : index
    %c0_0 = arith.constant 0 : index
    %0 = vector.load %arg0[%c0, %c0_0] : memref<64x1xi32, #tpu.memory_space<vmem>>, vector<64x1xi32>
    %1 = tpu.iota {dimensions = array<i32: 1>} : vector<64x32xi32>
    %2 = vector.broadcast %0 : vector<64x1xi32> to vector<64x32xi32>
    %3 = arith.cmpi eq, %2, %1 : vector<64x32xi32>
    %4 = arith.extui %3 : vector<64x32xi1> to vector<64x32xi32>
    %5 = arith.sitofp %4 : vector<64x32xi32> to vector<64x32xf32>
    %c0_1 = arith.constant 0 : index
    %c0_2 = arith.constant 0 : index
    %6 = vector.load %arg1[%c0_1, %c0_2] : memref<32x16xf32, #tpu.memory_space<vmem>>, vector<32x16xf32>
    %cst = arith.constant dense<0.000000e+00> : vector<64x16xf32>
    %7 = tpu.matmul %5, %6, %cst {dimension_numbers = #tpu.dot_dimension_numbers<[1], [0], [0], [1], [0, 0, 1, 1], [], []>} : vector<64x32xf32>, vector<32x16xf32>, vector<64x16xf32> -> vector<64x16xf32>
    %c0_3 = arith.constant 0 : index
    %c0_4 = arith.constant 0 : index
    %8 = vector.load %arg4[%c0_3, %c0_4] : memref<16x128xf32, #tpu.memory_space<vmem>>, vector<16x128xf32>
    %cst_5 = arith.constant dense<0.000000e+00> : vector<64x128xf32>
    %9 = tpu.matmul %7, %8, %cst_5 {dimension_numbers = #tpu.dot_dimension_numbers<[1], [0], [0], [1], [0, 0, 1, 1], [], []>} : vector<64x16xf32>, vector<16x128xf32>, vector<64x128xf32> -> vector<64x128xf32>
    %c0_6 = arith.constant 0 : index
    %c0_7 = arith.constant 0 : index
    %10 = vector.load %arg6[%c0_6, %c0_7] : memref<1x128xf32, #tpu.memory_space<vmem>>, vector<1x128xf32>
    %11 = vector.broadcast %10 : vector<1x128xf32> to vector<64x128xf32>
    %12 = arith.addf %9, %11 : vector<64x128xf32>
    %c0_8 = arith.constant 0 : index
    %c0_9 = arith.constant 0 : index
    %13 = vector.load %arg15[%c0_8, %c0_9] : memref<64x128xf32, #tpu.memory_space<vmem>>, vector<64x128xf32>
    tpu.vector_store %arg15[%c0_8, %c0_9], %12 {strides = array<i32>} : memref<64x128xf32, #tpu.memory_space<vmem>>, vector<64x128xf32>,
    %c0_10 = arith.constant 0 : index
    %c0_11 = arith.constant 0 : index
    %14 = vector.load %arg7[%c0_10, %c0_11] : memref<32x128xf32, #tpu.memory_space<vmem>>, vector<32x128xf32>
    %c0_12 = arith.constant 0 : index
    %c0_13 = arith.constant 0 : index
    %15 = vector.load %arg5[%c0_12, %c0_13] : memref<32x128xf32, #tpu.memory_space<vmem>>, vector<32x128xf32>
    %c0_14 = arith.constant 0 : index
    %c0_15 = arith.constant 0 : index
    %16 = vector.load %arg8[%c0_14, %c0_15] : memref<32x128xf32, #tpu.memory_space<vmem>>, vector<32x128xf32>
    %c0_16 = arith.constant 0 : index
    %c0_17 = arith.constant 0 : index
    %17 = vector.load %arg9[%c0_16, %c0_17] : memref<1x128xf32, #tpu.memory_space<vmem>>, vector<1x128xf32>
    %c0_18 = arith.constant 0 : index
    %c0_19 = arith.constant 0 : index
    %c0_20 = arith.constant 0 : index
    %18 = vector.load %arg2[%c0_18, %c0_19, %c0_20] : memref<2x8x32xf32, #tpu.memory_space<vmem>>, vector<1x8x32xf32>
    %19 = vector.shape_cast %18 : vector<1x8x32xf32> to vector<8x32xf32>
    %c1 = arith.constant 1 : index
    %c0_21 = arith.constant 0 : index
    %c0_22 = arith.constant 0 : index
    %20 = vector.load %arg2[%c1, %c0_21, %c0_22] : memref<2x8x32xf32, #tpu.memory_space<vmem>>, vector<1x8x32xf32>
    %21 = vector.shape_cast %20 : vector<1x8x32xf32> to vector<8x32xf32>
    %c0_23 = arith.constant 0 : index
    %c0_24 = arith.constant 0 : index
    %c0_25 = arith.constant 0 : index
    %22 = vector.load %arg3[%c0_23, %c0_24, %c0_25] : memref<2x8x32xf32, #tpu.memory_space<vmem>>, vector<1x8x32xf32>
    %23 = vector.shape_cast %22 : vector<1x8x32xf32> to vector<8x32xf32>
    %c1_26 = arith.constant 1 : index
    %c0_27 = arith.constant 0 : index
    %c0_28 = arith.constant 0 : index
    %24 = vector.load %arg3[%c1_26, %c0_27, %c0_28] : memref<2x8x32xf32, #tpu.memory_space<vmem>>, vector<1x8x32xf32>
    %25 = vector.shape_cast %24 : vector<1x8x32xf32> to vector<8x32xf32>
    %c0_29 = arith.constant 0 : index
    %c0_30 = arith.constant 0 : index
    %26 = vector.load %arg15[%c0_29, %c0_30] : memref<64x128xf32, #tpu.memory_space<vmem>>, vector<8x128xf32>
    %cst_31 = arith.constant dense<0.000000e+00> : vector<8x128xf32>
    %27 = tpu.matmul %19, %15, %cst_31 {dimension_numbers = #tpu.dot_dimension_numbers<[1], [0], [0], [1], [0, 0, 1, 1], [], []>} : vector<8x32xf32>, vector<32x128xf32>, vector<8x128xf32> -> vector<8x128xf32>
    %28 = arith.addf %26, %27 : vector<8x128xf32>
    %29 = vector.extract_strided_slice %28 {offsets = [0, 0], sizes = [8, 96], strides = [1, 1]} : vector<8x128xf32> to vector<8x96xf32>
    %30 = arith.negf %29 : vector<8x96xf32>
    %31 = math.exp %30 : vector<8x96xf32>
    %cst_32 = arith.constant 1.000000e+00 : f32
    %32 = vector.broadcast %cst_32 : f32 to vector<8x96xf32>
    %33 = arith.addf %32, %31 : vector<8x96xf32>
    %34 = arith.divf %32, %33 : vector<8x96xf32>
    %35 = vector.extract_strided_slice %28 {offsets = [0, 96], sizes = [8, 32], strides = [1, 1]} : vector<8x128xf32> to vector<8x32xf32>
    %36 = math.tanh %35 : vector<8x32xf32>
    %37 = vector.extract_strided_slice %34 {offsets = [0, 0], sizes = [8, 32], strides = [1, 1]} : vector<8x96xf32> to vector<8x32xf32>
    %38 = vector.extract_strided_slice %34 {offsets = [0, 32], sizes = [8, 32], strides = [1, 1]} : vector<8x96xf32> to vector<8x32xf32>
    %39 = vector.extract_strided_slice %34 {offsets = [0, 64], sizes = [8, 32], strides = [1, 1]} : vector<8x96xf32> to vector<8x32xf32>
    %40 = arith.mulf %38, %23 : vector<8x32xf32>
    %41 = arith.mulf %37, %36 : vector<8x32xf32>
    %42 = arith.addf %40, %41 : vector<8x32xf32>
    %43 = math.tanh %42 : vector<8x32xf32>
    %44 = arith.mulf %39, %43 : vector<8x32xf32>
    %cst_33 = arith.constant dense<0.000000e+00> : vector<8x128xf32>
    %45 = tpu.matmul %44, %14, %cst_33 {dimension_numbers = #tpu.dot_dimension_numbers<[1], [0], [0], [1], [0, 0, 1, 1], [], []>} : vector<8x32xf32>, vector<32x128xf32>, vector<8x128xf32> -> vector<8x128xf32>
    %cst_34 = arith.constant dense<0.000000e+00> : vector<8x128xf32>
    %46 = tpu.matmul %21, %16, %cst_34 {dimension_numbers = #tpu.dot_dimension_numbers<[1], [0], [0], [1], [0, 0, 1, 1], [], []>} : vector<8x32xf32>, vector<32x128xf32>, vector<8x128xf32> -> vector<8x128xf32>
    %47 = arith.addf %45, %46 : vector<8x128xf32>
    %48 = vector.broadcast %17 : vector<1x128xf32> to vector<8x128xf32>
    %49 = arith.addf %47, %48 : vector<8x128xf32>
    %50 = vector.extract_strided_slice %49 {offsets = [0, 0], sizes = [8, 96], strides = [1, 1]} : vector<8x128xf32> to vector<8x96xf32>
    %51 = arith.negf %50 : vector<8x96xf32>
    %52 = math.exp %51 : vector<8x96xf32>
    %cst_35 = arith.constant 1.000000e+00 : f32
    %53 = vector.broadcast %cst_35 : f32 to vector<8x96xf32>
    %54 = arith.addf %53, %52 : vector<8x96xf32>
    %55 = arith.divf %53, %54 : vector<8x96xf32>
    %56 = vector.extract_strided_slice %49 {offsets = [0, 96], sizes = [8, 32], strides = [1, 1]} : vector<8x128xf32> to vector<8x32xf32>
    %57 = math.tanh %56 : vector<8x32xf32>
    %58 = vector.extract_strided_slice %55 {offsets = [0, 0], sizes = [8, 32], strides = [1, 1]} : vector<8x96xf32> to vector<8x32xf32>
    %59 = vector.extract_strided_slice %55 {offsets = [0, 32], sizes = [8, 32], strides = [1, 1]} : vector<8x96xf32> to vector<8x32xf32>
    %60 = vector.extract_strided_slice %55 {offsets = [0, 64], sizes = [8, 32], strides = [1, 1]} : vector<8x96xf32> to vector<8x32xf32>
    %61 = arith.mulf %59, %25 : vector<8x32xf32>
    %62 = arith.mulf %58, %57 : vector<8x32xf32>
    %63 = arith.addf %61, %62 : vector<8x32xf32>
    %64 = math.tanh %63 : vector<8x32xf32>
    %65 = arith.mulf %60, %64 : vector<8x32xf32>
    %c0_36 = arith.constant 0 : index
    %c0_37 = arith.constant 0 : index
    %66 = vector.load %arg16[%c0_36, %c0_37] : memref<64x32xf32, #tpu.memory_space<vmem>>, vector<8x32xf32>
    tpu.vector_store %arg16[%c0_36, %c0_37], %65 {strides = array<i32>} : memref<64x32xf32, #tpu.memory_space<vmem>>, vector<8x32xf32>,
    %c8 = arith.constant 8 : index
    %c0_38 = arith.constant 0 : index
    %67 = vector.load %arg15[%c8, %c0_38] : memref<64x128xf32, #tpu.memory_space<vmem>>, vector<8x128xf32>
    %cst_39 = arith.constant dense<0.000000e+00> : vector<8x128xf32>
    %68 = tpu.matmul %44, %15, %cst_39 {dimension_numbers = #tpu.dot_dimension_numbers<[1], [0], [0], [1], [0, 0, 1, 1], [], []>} : vector<8x32xf32>, vector<32x128xf32>, vector<8x128xf32> -> vector<8x128xf32>
    %69 = arith.addf %67, %68 : vector<8x128xf32>
    %70 = vector.extract_strided_slice %69 {offsets = [0, 0], sizes = [8, 96], strides = [1, 1]} : vector<8x128xf32> to vector<8x96xf32>
    %71 = arith.negf %70 : vector<8x96xf32>
    %72 = math.exp %71 : vector<8x96xf32>
    %cst_40 = arith.constant 1.000000e+00 : f32
    %73 = vector.broadcast %cst_40 : f32 to vector<8x96xf32>
    %74 = arith.addf %73, %72 : vector<8x96xf32>
    %75 = arith.divf %73, %74 : vector<8x96xf32>
    %76 = vector.extract_strided_slice %69 {offsets = [0, 96], sizes = [8, 32], strides = [1, 1]} : vector<8x128xf32> to vector<8x32xf32>
    %77 = math.tanh %76 : vector<8x32xf32>
    %78 = vector.extract_strided_slice %75 {offsets = [0, 0], sizes = [8, 32], strides = [1, 1]} : vector<8x96xf32> to vector<8x32xf32>
    %79 = vector.extract_strided_slice %75 {offsets = [0, 32], sizes = [8, 32], strides = [1, 1]} : vector<8x96xf32> to vector<8x32xf32>
    %80 = vector.extract_strided_slice %75 {offsets = [0, 64], sizes = [8, 32], strides = [1, 1]} : vector<8x96xf32> to vector<8x32xf32>
    %81 = arith.mulf %79, %42 : vector<8x32xf32>
    %82 = arith.mulf %78, %77 : vector<8x32xf32>
    %83 = arith.addf %81, %82 : vector<8x32xf32>
    %84 = math.tanh %83 : vector<8x32xf32>
    %85 = arith.mulf %80, %84 : vector<8x32xf32>
    %cst_41 = arith.constant dense<0.000000e+00> : vector<8x128xf32>
    %86 = tpu.matmul %85, %14, %cst_41 {dimension_numbers = #tpu.dot_dimension_numbers<[1], [0], [0], [1], [0, 0, 1, 1], [], []>} : vector<8x32xf32>, vector<32x128xf32>, vector<8x128xf32> -> vector<8x128xf32>
    %cst_42 = arith.constant dense<0.000000e+00> : vector<8x128xf32>
    %87 = tpu.matmul %65, %16, %cst_42 {dimension_numbers = #tpu.dot_dimension_numbers<[1], [0], [0], [1], [0, 0, 1, 1], [], []>} : vector<8x32xf32>, vector<32x128xf32>, vector<8x128xf32> -> vector<8x128xf32>
    %88 = arith.addf %86, %87 : vector<8x128xf32>
    %89 = vector.broadcast %17 : vector<1x128xf32> to vector<8x128xf32>
    %90 = arith.addf %88, %89 : vector<8x128xf32>
    %91 = vector.extract_strided_slice %90 {offsets = [0, 0], sizes = [8, 96], strides = [1, 1]} : vector<8x128xf32> to vector<8x96xf32>
    %92 = arith.negf %91 : vector<8x96xf32>
    %93 = math.exp %92 : vector<8x96xf32>
    %cst_43 = arith.constant 1.000000e+00 : f32
    %94 = vector.broadcast %cst_43 : f32 to vector<8x96xf32>
    %95 = arith.addf %94, %93 : vector<8x96xf32>
    %96 = arith.divf %94, %95 : vector<8x96xf32>
    %97 = vector.extract_strided_slice %90 {offsets = [0, 96], sizes = [8, 32], strides = [1, 1]} : vector<8x128xf32> to vector<8x32xf32>
    %98 = math.tanh %97 : vector<8x32xf32>
    %99 = vector.extract_strided_slice %96 {offsets = [0, 0], sizes = [8, 32], strides = [1, 1]} : vector<8x96xf32> to vector<8x32xf32>
    %100 = vector.extract_strided_slice %96 {offsets = [0, 32], sizes = [8, 32], strides = [1, 1]} : vector<8x96xf32> to vector<8x32xf32>
    %101 = vector.extract_strided_slice %96 {offsets = [0, 64], sizes = [8, 32], strides = [1, 1]} : vector<8x96xf32> to vector<8x32xf32>
    %102 = arith.mulf %100, %63 : vector<8x32xf32>
    %103 = arith.mulf %99, %98 : vector<8x32xf32>
    %104 = arith.addf %102, %103 : vector<8x32xf32>
    %105 = math.tanh %104 : vector<8x32xf32>
    %106 = arith.mulf %101, %105 : vector<8x32xf32>
    %c8_44 = arith.constant 8 : index
    %c0_45 = arith.constant 0 : index
    %107 = vector.load %arg16[%c8_44, %c0_45] : memref<64x32xf32, #tpu.memory_space<vmem>>, vector<8x32xf32>
    tpu.vector_store %arg16[%c8_44, %c0_45], %106 {strides = array<i32>} : memref<64x32xf32, #tpu.memory_space<vmem>>, vector<8x32xf32>,
    %c16 = arith.constant 16 : index
    %c0_46 = arith.constant 0 : index
    %108 = vector.load %arg15[%c16, %c0_46] : memref<64x128xf32, #tpu.memory_space<vmem>>, vector<8x128xf32>
    %cst_47 = arith.constant dense<0.000000e+00> : vector<8x128xf32>
    %109 = tpu.matmul %85, %15, %cst_47 {dimension_numbers = #tpu.dot_dimension_numbers<[1], [0], [0], [1], [0, 0, 1, 1], [], []>} : vector<8x32xf32>, vector<32x128xf32>, vector<8x128xf32> -> vector<8x128xf32>
    %110 = arith.addf %108, %109 : vector<8x128xf32>
    %111 = vector.extract_strided_slice %110 {offsets = [0, 0], sizes = [8, 96], strides = [1, 1]} : vector<8x128xf32> to vector<8x96xf32>
    %112 = arith.negf %111 : vector<8x96xf32>
    %113 = math.exp %112 : vector<8x96xf32>
    %cst_48 = arith.constant 1.000000e+00 : f32
    %114 = vector.broadcast %cst_48 : f32 to vector<8x96xf32>
    %115 = arith.addf %114, %113 : vector<8x96xf32>
    %116 = arith.divf %114, %115 : vector<8x96xf32>
    %117 = vector.extract_strided_slice %110 {offsets = [0, 96], sizes = [8, 32], strides = [1, 1]} : vector<8x128xf32> to vector<8x32xf32>
    %118 = math.tanh %117 : vector<8x32xf32>
    %119 = vector.extract_strided_slice %116 {offsets = [0, 0], sizes = [8, 32], strides = [1, 1]} : vector<8x96xf32> to vector<8x32xf32>
    %120 = vector.extract_strided_slice %116 {offsets = [0, 32], sizes = [8, 32], strides = [1, 1]} : vector<8x96xf32> to vector<8x32xf32>
    %121 = vector.extract_strided_slice %116 {offsets = [0, 64], sizes = [8, 32], strides = [1, 1]} : vector<8x96xf32> to vector<8x32xf32>
    %122 = arith.mulf %120, %83 : vector<8x32xf32>
    %123 = arith.mulf %119, %118 : vector<8x32xf32>
    %124 = arith.addf %122, %123 : vector<8x32xf32>
    %125 = math.tanh %124 : vector<8x32xf32>
    %126 = arith.mulf %121, %125 : vector<8x32xf32>
    %cst_49 = arith.constant dense<0.000000e+00> : vector<8x128xf32>
    %127 = tpu.matmul %126, %14, %cst_49 {dimension_numbers = #tpu.dot_dimension_numbers<[1], [0], [0], [1], [0, 0, 1, 1], [], []>} : vector<8x32xf32>, vector<32x128xf32>, vector<8x128xf32> -> vector<8x128xf32>
    %cst_50 = arith.constant dense<0.000000e+00> : vector<8x128xf32>
    %128 = tpu.matmul %106, %16, %cst_50 {dimension_numbers = #tpu.dot_dimension_numbers<[1], [0], [0], [1], [0, 0, 1, 1], [], []>} : vector<8x32xf32>, vector<32x128xf32>, vector<8x128xf32> -> vector<8x128xf32>
    %129 = arith.addf %127, %128 : vector<8x128xf32>
    %130 = vector.broadcast %17 : vector<1x128xf32> to vector<8x128xf32>
    %131 = arith.addf %129, %130 : vector<8x128xf32>
    %132 = vector.extract_strided_slice %131 {offsets = [0, 0], sizes = [8, 96], strides = [1, 1]} : vector<8x128xf32> to vector<8x96xf32>
    %133 = arith.negf %132 : vector<8x96xf32>
    %134 = math.exp %133 : vector<8x96xf32>
    %cst_51 = arith.constant 1.000000e+00 : f32
    %135 = vector.broadcast %cst_51 : f32 to vector<8x96xf32>
    %136 = arith.addf %135, %134 : vector<8x96xf32>
    %137 = arith.divf %135, %136 : vector<8x96xf32>
    %138 = vector.extract_strided_slice %131 {offsets = [0, 96], sizes = [8, 32], strides = [1, 1]} : vector<8x128xf32> to vector<8x32xf32>
    %139 = math.tanh %138 : vector<8x32xf32>
    %140 = vector.extract_strided_slice %137 {offsets = [0, 0], sizes = [8, 32], strides = [1, 1]} : vector<8x96xf32> to vector<8x32xf32>
    %141 = vector.extract_strided_slice %137 {offsets = [0, 32], sizes = [8, 32], strides = [1, 1]} : vector<8x96xf32> to vector<8x32xf32>
    %142 = vector.extract_strided_slice %137 {offsets = [0, 64], sizes = [8, 32], strides = [1, 1]} : vector<8x96xf32> to vector<8x32xf32>
    %143 = arith.mulf %141, %104 : vector<8x32xf32>
    %144 = arith.mulf %140, %139 : vector<8x32xf32>
    %145 = arith.addf %143, %144 : vector<8x32xf32>
    %146 = math.tanh %145 : vector<8x32xf32>
    %147 = arith.mulf %142, %146 : vector<8x32xf32>
    %c16_52 = arith.constant 16 : index
    %c0_53 = arith.constant 0 : index
    %148 = vector.load %arg16[%c16_52, %c0_53] : memref<64x32xf32, #tpu.memory_space<vmem>>, vector<8x32xf32>
    tpu.vector_store %arg16[%c16_52, %c0_53], %147 {strides = array<i32>} : memref<64x32xf32, #tpu.memory_space<vmem>>, vector<8x32xf32>,
    %c24 = arith.constant 24 : index
    %c0_54 = arith.constant 0 : index
    %149 = vector.load %arg15[%c24, %c0_54] : memref<64x128xf32, #tpu.memory_space<vmem>>, vector<8x128xf32>
    %cst_55 = arith.constant dense<0.000000e+00> : vector<8x128xf32>
    %150 = tpu.matmul %126, %15, %cst_55 {dimension_numbers = #tpu.dot_dimension_numbers<[1], [0], [0], [1], [0, 0, 1, 1], [], []>} : vector<8x32xf32>, vector<32x128xf32>, vector<8x128xf32> -> vector<8x128xf32>
    %151 = arith.addf %149, %150 : vector<8x128xf32>
    %152 = vector.extract_strided_slice %151 {offsets = [0, 0], sizes = [8, 96], strides = [1, 1]} : vector<8x128xf32> to vector<8x96xf32>
    %153 = arith.negf %152 : vector<8x96xf32>
    %154 = math.exp %153 : vector<8x96xf32>
    %cst_56 = arith.constant 1.000000e+00 : f32
    %155 = vector.broadcast %cst_56 : f32 to vector<8x96xf32>
    %156 = arith.addf %155, %154 : vector<8x96xf32>
    %157 = arith.divf %155, %156 : vector<8x96xf32>
    %158 = vector.extract_strided_slice %151 {offsets = [0, 96], sizes = [8, 32], strides = [1, 1]} : vector<8x128xf32> to vector<8x32xf32>
    %159 = math.tanh %158 : vector<8x32xf32>
    %160 = vector.extract_strided_slice %157 {offsets = [0, 0], sizes = [8, 32], strides = [1, 1]} : vector<8x96xf32> to vector<8x32xf32>
    %161 = vector.extract_strided_slice %157 {offsets = [0, 32], sizes = [8, 32], strides = [1, 1]} : vector<8x96xf32> to vector<8x32xf32>
    %162 = vector.extract_strided_slice %157 {offsets = [0, 64], sizes = [8, 32], strides = [1, 1]} : vector<8x96xf32> to vector<8x32xf32>
    %163 = arith.mulf %161, %124 : vector<8x32xf32>
    %164 = arith.mulf %160, %159 : vector<8x32xf32>
    %165 = arith.addf %163, %164 : vector<8x32xf32>
    %166 = math.tanh %165 : vector<8x32xf32>
    %167 = arith.mulf %162, %166 : vector<8x32xf32>
    %cst_57 = arith.constant dense<0.000000e+00> : vector<8x128xf32>
    %168 = tpu.matmul %167, %14, %cst_57 {dimension_numbers = #tpu.dot_dimension_numbers<[1], [0], [0], [1], [0, 0, 1, 1], [], []>} : vector<8x32xf32>, vector<32x128xf32>, vector<8x128xf32> -> vector<8x128xf32>
    %cst_58 = arith.constant dense<0.000000e+00> : vector<8x128xf32>
    %169 = tpu.matmul %147, %16, %cst_58 {dimension_numbers = #tpu.dot_dimension_numbers<[1], [0], [0], [1], [0, 0, 1, 1], [], []>} : vector<8x32xf32>, vector<32x128xf32>, vector<8x128xf32> -> vector<8x128xf32>
    %170 = arith.addf %168, %169 : vector<8x128xf32>
    %171 = vector.broadcast %17 : vector<1x128xf32> to vector<8x128xf32>
    %172 = arith.addf %170, %171 : vector<8x128xf32>
    %173 = vector.extract_strided_slice %172 {offsets = [0, 0], sizes = [8, 96], strides = [1, 1]} : vector<8x128xf32> to vector<8x96xf32>
    %174 = arith.negf %173 : vector<8x96xf32>
    %175 = math.exp %174 : vector<8x96xf32>
    %cst_59 = arith.constant 1.000000e+00 : f32
    %176 = vector.broadcast %cst_59 : f32 to vector<8x96xf32>
    %177 = arith.addf %176, %175 : vector<8x96xf32>
    %178 = arith.divf %176, %177 : vector<8x96xf32>
    %179 = vector.extract_strided_slice %172 {offsets = [0, 96], sizes = [8, 32], strides = [1, 1]} : vector<8x128xf32> to vector<8x32xf32>
    %180 = math.tanh %179 : vector<8x32xf32>
    %181 = vector.extract_strided_slice %178 {offsets = [0, 0], sizes = [8, 32], strides = [1, 1]} : vector<8x96xf32> to vector<8x32xf32>
    %182 = vector.extract_strided_slice %178 {offsets = [0, 32], sizes = [8, 32], strides = [1, 1]} : vector<8x96xf32> to vector<8x32xf32>
    %183 = vector.extract_strided_slice %178 {offsets = [0, 64], sizes = [8, 32], strides = [1, 1]} : vector<8x96xf32> to vector<8x32xf32>
    %184 = arith.mulf %182, %145 : vector<8x32xf32>
    %185 = arith.mulf %181, %180 : vector<8x32xf32>
    %186 = arith.addf %184, %185 : vector<8x32xf32>
    %187 = math.tanh %186 : vector<8x32xf32>
    %188 = arith.mulf %183, %187 : vector<8x32xf32>
    %c24_60 = arith.constant 24 : index
    %c0_61 = arith.constant 0 : index
    %189 = vector.load %arg16[%c24_60, %c0_61] : memref<64x32xf32, #tpu.memory_space<vmem>>, vector<8x32xf32>
    tpu.vector_store %arg16[%c24_60, %c0_61], %188 {strides = array<i32>} : memref<64x32xf32, #tpu.memory_space<vmem>>, vector<8x32xf32>,
    %c32 = arith.constant 32 : index
    %c0_62 = arith.constant 0 : index
    %190 = vector.load %arg15[%c32, %c0_62] : memref<64x128xf32, #tpu.memory_space<vmem>>, vector<8x128xf32>
    %cst_63 = arith.constant dense<0.000000e+00> : vector<8x128xf32>
    %191 = tpu.matmul %167, %15, %cst_63 {dimension_numbers = #tpu.dot_dimension_numbers<[1], [0], [0], [1], [0, 0, 1, 1], [], []>} : vector<8x32xf32>, vector<32x128xf32>, vector<8x128xf32> -> vector<8x128xf32>
    %192 = arith.addf %190, %191 : vector<8x128xf32>
    %193 = vector.extract_strided_slice %192 {offsets = [0, 0], sizes = [8, 96], strides = [1, 1]} : vector<8x128xf32> to vector<8x96xf32>
    %194 = arith.negf %193 : vector<8x96xf32>
    %195 = math.exp %194 : vector<8x96xf32>
    %cst_64 = arith.constant 1.000000e+00 : f32
    %196 = vector.broadcast %cst_64 : f32 to vector<8x96xf32>
    %197 = arith.addf %196, %195 : vector<8x96xf32>
    %198 = arith.divf %196, %197 : vector<8x96xf32>
    %199 = vector.extract_strided_slice %192 {offsets = [0, 96], sizes = [8, 32], strides = [1, 1]} : vector<8x128xf32> to vector<8x32xf32>
    %200 = math.tanh %199 : vector<8x32xf32>
    %201 = vector.extract_strided_slice %198 {offsets = [0, 0], sizes = [8, 32], strides = [1, 1]} : vector<8x96xf32> to vector<8x32xf32>
    %202 = vector.extract_strided_slice %198 {offsets = [0, 32], sizes = [8, 32], strides = [1, 1]} : vector<8x96xf32> to vector<8x32xf32>
    %203 = vector.extract_strided_slice %198 {offsets = [0, 64], sizes = [8, 32], strides = [1, 1]} : vector<8x96xf32> to vector<8x32xf32>
    %204 = arith.mulf %202, %165 : vector<8x32xf32>
    %205 = arith.mulf %201, %200 : vector<8x32xf32>
    %206 = arith.addf %204, %205 : vector<8x32xf32>
    %207 = math.tanh %206 : vector<8x32xf32>
    %208 = arith.mulf %203, %207 : vector<8x32xf32>
    %cst_65 = arith.constant dense<0.000000e+00> : vector<8x128xf32>
    %209 = tpu.matmul %208, %14, %cst_65 {dimension_numbers = #tpu.dot_dimension_numbers<[1], [0], [0], [1], [0, 0, 1, 1], [], []>} : vector<8x32xf32>, vector<32x128xf32>, vector<8x128xf32> -> vector<8x128xf32>
    %cst_66 = arith.constant dense<0.000000e+00> : vector<8x128xf32>
    %210 = tpu.matmul %188, %16, %cst_66 {dimension_numbers = #tpu.dot_dimension_numbers<[1], [0], [0], [1], [0, 0, 1, 1], [], []>} : vector<8x32xf32>, vector<32x128xf32>, vector<8x128xf32> -> vector<8x128xf32>
    %211 = arith.addf %209, %210 : vector<8x128xf32>
    %212 = vector.broadcast %17 : vector<1x128xf32> to vector<8x128xf32>
    %213 = arith.addf %211, %212 : vector<8x128xf32>
    %214 = vector.extract_strided_slice %213 {offsets = [0, 0], sizes = [8, 96], strides = [1, 1]} : vector<8x128xf32> to vector<8x96xf32>
    %215 = arith.negf %214 : vector<8x96xf32>
    %216 = math.exp %215 : vector<8x96xf32>
    %cst_67 = arith.constant 1.000000e+00 : f32
    %217 = vector.broadcast %cst_67 : f32 to vector<8x96xf32>
    %218 = arith.addf %217, %216 : vector<8x96xf32>
    %219 = arith.divf %217, %218 : vector<8x96xf32>
    %220 = vector.extract_strided_slice %213 {offsets = [0, 96], sizes = [8, 32], strides = [1, 1]} : vector<8x128xf32> to vector<8x32xf32>
    %221 = math.tanh %220 : vector<8x32xf32>
    %222 = vector.extract_strided_slice %219 {offsets = [0, 0], sizes = [8, 32], strides = [1, 1]} : vector<8x96xf32> to vector<8x32xf32>
    %223 = vector.extract_strided_slice %219 {offsets = [0, 32], sizes = [8, 32], strides = [1, 1]} : vector<8x96xf32> to vector<8x32xf32>
    %224 = vector.extract_strided_slice %219 {offsets = [0, 64], sizes = [8, 32], strides = [1, 1]} : vector<8x96xf32> to vector<8x32xf32>
    %225 = arith.mulf %223, %186 : vector<8x32xf32>
    %226 = arith.mulf %222, %221 : vector<8x32xf32>
    %227 = arith.addf %225, %226 : vector<8x32xf32>
    %228 = math.tanh %227 : vector<8x32xf32>
    %229 = arith.mulf %224, %228 : vector<8x32xf32>
    %c32_68 = arith.constant 32 : index
    %c0_69 = arith.constant 0 : index
    %230 = vector.load %arg16[%c32_68, %c0_69] : memref<64x32xf32, #tpu.memory_space<vmem>>, vector<8x32xf32>
    tpu.vector_store %arg16[%c32_68, %c0_69], %229 {strides = array<i32>} : memref<64x32xf32, #tpu.memory_space<vmem>>, vector<8x32xf32>,
    %c40 = arith.constant 40 : index
    %c0_70 = arith.constant 0 : index
    %231 = vector.load %arg15[%c40, %c0_70] : memref<64x128xf32, #tpu.memory_space<vmem>>, vector<8x128xf32>
    %cst_71 = arith.constant dense<0.000000e+00> : vector<8x128xf32>
    %232 = tpu.matmul %208, %15, %cst_71 {dimension_numbers = #tpu.dot_dimension_numbers<[1], [0], [0], [1], [0, 0, 1, 1], [], []>} : vector<8x32xf32>, vector<32x128xf32>, vector<8x128xf32> -> vector<8x128xf32>
    %233 = arith.addf %231, %232 : vector<8x128xf32>
    %234 = vector.extract_strided_slice %233 {offsets = [0, 0], sizes = [8, 96], strides = [1, 1]} : vector<8x128xf32> to vector<8x96xf32>
    %235 = arith.negf %234 : vector<8x96xf32>
    %236 = math.exp %235 : vector<8x96xf32>
    %cst_72 = arith.constant 1.000000e+00 : f32
    %237 = vector.broadcast %cst_72 : f32 to vector<8x96xf32>
    %238 = arith.addf %237, %236 : vector<8x96xf32>
    %239 = arith.divf %237, %238 : vector<8x96xf32>
    %240 = vector.extract_strided_slice %233 {offsets = [0, 96], sizes = [8, 32], strides = [1, 1]} : vector<8x128xf32> to vector<8x32xf32>
    %241 = math.tanh %240 : vector<8x32xf32>
    %242 = vector.extract_strided_slice %239 {offsets = [0, 0], sizes = [8, 32], strides = [1, 1]} : vector<8x96xf32> to vector<8x32xf32>
    %243 = vector.extract_strided_slice %239 {offsets = [0, 32], sizes = [8, 32], strides = [1, 1]} : vector<8x96xf32> to vector<8x32xf32>
    %244 = vector.extract_strided_slice %239 {offsets = [0, 64], sizes = [8, 32], strides = [1, 1]} : vector<8x96xf32> to vector<8x32xf32>
    %245 = arith.mulf %243, %206 : vector<8x32xf32>
    %246 = arith.mulf %242, %241 : vector<8x32xf32>
    %247 = arith.addf %245, %246 : vector<8x32xf32>
    %248 = math.tanh %247 : vector<8x32xf32>
    %249 = arith.mulf %244, %248 : vector<8x32xf32>
    %cst_73 = arith.constant dense<0.000000e+00> : vector<8x128xf32>
    %250 = tpu.matmul %249, %14, %cst_73 {dimension_numbers = #tpu.dot_dimension_numbers<[1], [0], [0], [1], [0, 0, 1, 1], [], []>} : vector<8x32xf32>, vector<32x128xf32>, vector<8x128xf32> -> vector<8x128xf32>
    %cst_74 = arith.constant dense<0.000000e+00> : vector<8x128xf32>
    %251 = tpu.matmul %229, %16, %cst_74 {dimension_numbers = #tpu.dot_dimension_numbers<[1], [0], [0], [1], [0, 0, 1, 1], [], []>} : vector<8x32xf32>, vector<32x128xf32>, vector<8x128xf32> -> vector<8x128xf32>
    %252 = arith.addf %250, %251 : vector<8x128xf32>
    %253 = vector.broadcast %17 : vector<1x128xf32> to vector<8x128xf32>
    %254 = arith.addf %252, %253 : vector<8x128xf32>
    %255 = vector.extract_strided_slice %254 {offsets = [0, 0], sizes = [8, 96], strides = [1, 1]} : vector<8x128xf32> to vector<8x96xf32>
    %256 = arith.negf %255 : vector<8x96xf32>
    %257 = math.exp %256 : vector<8x96xf32>
    %cst_75 = arith.constant 1.000000e+00 : f32
    %258 = vector.broadcast %cst_75 : f32 to vector<8x96xf32>
    %259 = arith.addf %258, %257 : vector<8x96xf32>
    %260 = arith.divf %258, %259 : vector<8x96xf32>
    %261 = vector.extract_strided_slice %254 {offsets = [0, 96], sizes = [8, 32], strides = [1, 1]} : vector<8x128xf32> to vector<8x32xf32>
    %262 = math.tanh %261 : vector<8x32xf32>
    %263 = vector.extract_strided_slice %260 {offsets = [0, 0], sizes = [8, 32], strides = [1, 1]} : vector<8x96xf32> to vector<8x32xf32>
    %264 = vector.extract_strided_slice %260 {offsets = [0, 32], sizes = [8, 32], strides = [1, 1]} : vector<8x96xf32> to vector<8x32xf32>
    %265 = vector.extract_strided_slice %260 {offsets = [0, 64], sizes = [8, 32], strides = [1, 1]} : vector<8x96xf32> to vector<8x32xf32>
    %266 = arith.mulf %264, %227 : vector<8x32xf32>
    %267 = arith.mulf %263, %262 : vector<8x32xf32>
    %268 = arith.addf %266, %267 : vector<8x32xf32>
    %269 = math.tanh %268 : vector<8x32xf32>
    %270 = arith.mulf %265, %269 : vector<8x32xf32>
    %c40_76 = arith.constant 40 : index
    %c0_77 = arith.constant 0 : index
    %271 = vector.load %arg16[%c40_76, %c0_77] : memref<64x32xf32, #tpu.memory_space<vmem>>, vector<8x32xf32>
    tpu.vector_store %arg16[%c40_76, %c0_77], %270 {strides = array<i32>} : memref<64x32xf32, #tpu.memory_space<vmem>>, vector<8x32xf32>,
    %c48 = arith.constant 48 : index
    %c0_78 = arith.constant 0 : index
    %272 = vector.load %arg15[%c48, %c0_78] : memref<64x128xf32, #tpu.memory_space<vmem>>, vector<8x128xf32>
    %cst_79 = arith.constant dense<0.000000e+00> : vector<8x128xf32>
    %273 = tpu.matmul %249, %15, %cst_79 {dimension_numbers = #tpu.dot_dimension_numbers<[1], [0], [0], [1], [0, 0, 1, 1], [], []>} : vector<8x32xf32>, vector<32x128xf32>, vector<8x128xf32> -> vector<8x128xf32>
    %274 = arith.addf %272, %273 : vector<8x128xf32>
    %275 = vector.extract_strided_slice %274 {offsets = [0, 0], sizes = [8, 96], strides = [1, 1]} : vector<8x128xf32> to vector<8x96xf32>
    %276 = arith.negf %275 : vector<8x96xf32>
    %277 = math.exp %276 : vector<8x96xf32>
    %cst_80 = arith.constant 1.000000e+00 : f32
    %278 = vector.broadcast %cst_80 : f32 to vector<8x96xf32>
    %279 = arith.addf %278, %277 : vector<8x96xf32>
    %280 = arith.divf %278, %279 : vector<8x96xf32>
    %281 = vector.extract_strided_slice %274 {offsets = [0, 96], sizes = [8, 32], strides = [1, 1]} : vector<8x128xf32> to vector<8x32xf32>
    %282 = math.tanh %281 : vector<8x32xf32>
    %283 = vector.extract_strided_slice %280 {offsets = [0, 0], sizes = [8, 32], strides = [1, 1]} : vector<8x96xf32> to vector<8x32xf32>
    %284 = vector.extract_strided_slice %280 {offsets = [0, 32], sizes = [8, 32], strides = [1, 1]} : vector<8x96xf32> to vector<8x32xf32>
    %285 = vector.extract_strided_slice %280 {offsets = [0, 64], sizes = [8, 32], strides = [1, 1]} : vector<8x96xf32> to vector<8x32xf32>
    %286 = arith.mulf %284, %247 : vector<8x32xf32>
    %287 = arith.mulf %283, %282 : vector<8x32xf32>
    %288 = arith.addf %286, %287 : vector<8x32xf32>
    %289 = math.tanh %288 : vector<8x32xf32>
    %290 = arith.mulf %285, %289 : vector<8x32xf32>
    %cst_81 = arith.constant dense<0.000000e+00> : vector<8x128xf32>
    %291 = tpu.matmul %290, %14, %cst_81 {dimension_numbers = #tpu.dot_dimension_numbers<[1], [0], [0], [1], [0, 0, 1, 1], [], []>} : vector<8x32xf32>, vector<32x128xf32>, vector<8x128xf32> -> vector<8x128xf32>
    %cst_82 = arith.constant dense<0.000000e+00> : vector<8x128xf32>
    %292 = tpu.matmul %270, %16, %cst_82 {dimension_numbers = #tpu.dot_dimension_numbers<[1], [0], [0], [1], [0, 0, 1, 1], [], []>} : vector<8x32xf32>, vector<32x128xf32>, vector<8x128xf32> -> vector<8x128xf32>
    %293 = arith.addf %291, %292 : vector<8x128xf32>
    %294 = vector.broadcast %17 : vector<1x128xf32> to vector<8x128xf32>
    %295 = arith.addf %293, %294 : vector<8x128xf32>
    %296 = vector.extract_strided_slice %295 {offsets = [0, 0], sizes = [8, 96], strides = [1, 1]} : vector<8x128xf32> to vector<8x96xf32>
    %297 = arith.negf %296 : vector<8x96xf32>
    %298 = math.exp %297 : vector<8x96xf32>
    %cst_83 = arith.constant 1.000000e+00 : f32
    %299 = vector.broadcast %cst_83 : f32 to vector<8x96xf32>
    %300 = arith.addf %299, %298 : vector<8x96xf32>
    %301 = arith.divf %299, %300 : vector<8x96xf32>
    %302 = vector.extract_strided_slice %295 {offsets = [0, 96], sizes = [8, 32], strides = [1, 1]} : vector<8x128xf32> to vector<8x32xf32>
    %303 = math.tanh %302 : vector<8x32xf32>
    %304 = vector.extract_strided_slice %301 {offsets = [0, 0], sizes = [8, 32], strides = [1, 1]} : vector<8x96xf32> to vector<8x32xf32>
    %305 = vector.extract_strided_slice %301 {offsets = [0, 32], sizes = [8, 32], strides = [1, 1]} : vector<8x96xf32> to vector<8x32xf32>
    %306 = vector.extract_strided_slice %301 {offsets = [0, 64], sizes = [8, 32], strides = [1, 1]} : vector<8x96xf32> to vector<8x32xf32>
    %307 = arith.mulf %305, %268 : vector<8x32xf32>
    %308 = arith.mulf %304, %303 : vector<8x32xf32>
    %309 = arith.addf %307, %308 : vector<8x32xf32>
    %310 = math.tanh %309 : vector<8x32xf32>
    %311 = arith.mulf %306, %310 : vector<8x32xf32>
    %c48_84 = arith.constant 48 : index
    %c0_85 = arith.constant 0 : index
    %312 = vector.load %arg16[%c48_84, %c0_85] : memref<64x32xf32, #tpu.memory_space<vmem>>, vector<8x32xf32>
    tpu.vector_store %arg16[%c48_84, %c0_85], %311 {strides = array<i32>} : memref<64x32xf32, #tpu.memory_space<vmem>>, vector<8x32xf32>,
    %c56 = arith.constant 56 : index
    %c0_86 = arith.constant 0 : index
    %313 = vector.load %arg15[%c56, %c0_86] : memref<64x128xf32, #tpu.memory_space<vmem>>, vector<8x128xf32>
    %cst_87 = arith.constant dense<0.000000e+00> : vector<8x128xf32>
    %314 = tpu.matmul %290, %15, %cst_87 {dimension_numbers = #tpu.dot_dimension_numbers<[1], [0], [0], [1], [0, 0, 1, 1], [], []>} : vector<8x32xf32>, vector<32x128xf32>, vector<8x128xf32> -> vector<8x128xf32>
    %315 = arith.addf %313, %314 : vector<8x128xf32>
    %316 = vector.extract_strided_slice %315 {offsets = [0, 0], sizes = [8, 96], strides = [1, 1]} : vector<8x128xf32> to vector<8x96xf32>
    %317 = arith.negf %316 : vector<8x96xf32>
    %318 = math.exp %317 : vector<8x96xf32>
    %cst_88 = arith.constant 1.000000e+00 : f32
    %319 = vector.broadcast %cst_88 : f32 to vector<8x96xf32>
    %320 = arith.addf %319, %318 : vector<8x96xf32>
    %321 = arith.divf %319, %320 : vector<8x96xf32>
    %322 = vector.extract_strided_slice %315 {offsets = [0, 96], sizes = [8, 32], strides = [1, 1]} : vector<8x128xf32> to vector<8x32xf32>
    %323 = math.tanh %322 : vector<8x32xf32>
    %324 = vector.extract_strided_slice %321 {offsets = [0, 0], sizes = [8, 32], strides = [1, 1]} : vector<8x96xf32> to vector<8x32xf32>
    %325 = vector.extract_strided_slice %321 {offsets = [0, 32], sizes = [8, 32], strides = [1, 1]} : vector<8x96xf32> to vector<8x32xf32>
    %326 = vector.extract_strided_slice %321 {offsets = [0, 64], sizes = [8, 32], strides = [1, 1]} : vector<8x96xf32> to vector<8x32xf32>
    %327 = arith.mulf %325, %288 : vector<8x32xf32>
    %328 = arith.mulf %324, %323 : vector<8x32xf32>
    %329 = arith.addf %327, %328 : vector<8x32xf32>
    %330 = math.tanh %329 : vector<8x32xf32>
    %331 = arith.mulf %326, %330 : vector<8x32xf32>
    %cst_89 = arith.constant dense<0.000000e+00> : vector<8x128xf32>
    %332 = tpu.matmul %331, %14, %cst_89 {dimension_numbers = #tpu.dot_dimension_numbers<[1], [0], [0], [1], [0, 0, 1, 1], [], []>} : vector<8x32xf32>, vector<32x128xf32>, vector<8x128xf32> -> vector<8x128xf32>
    %cst_90 = arith.constant dense<0.000000e+00> : vector<8x128xf32>
    %333 = tpu.matmul %311, %16, %cst_90 {dimension_numbers = #tpu.dot_dimension_numbers<[1], [0], [0], [1], [0, 0, 1, 1], [], []>} : vector<8x32xf32>, vector<32x128xf32>, vector<8x128xf32> -> vector<8x128xf32>
    %334 = arith.addf %332, %333 : vector<8x128xf32>
    %335 = vector.broadcast %17 : vector<1x128xf32> to vector<8x128xf32>
    %336 = arith.addf %334, %335 : vector<8x128xf32>
    %337 = vector.extract_strided_slice %336 {offsets = [0, 0], sizes = [8, 96], strides = [1, 1]} : vector<8x128xf32> to vector<8x96xf32>
    %338 = arith.negf %337 : vector<8x96xf32>
    %339 = math.exp %338 : vector<8x96xf32>
    %cst_91 = arith.constant 1.000000e+00 : f32
    %340 = vector.broadcast %cst_91 : f32 to vector<8x96xf32>
    %341 = arith.addf %340, %339 : vector<8x96xf32>
    %342 = arith.divf %340, %341 : vector<8x96xf32>
    %343 = vector.extract_strided_slice %336 {offsets = [0, 96], sizes = [8, 32], strides = [1, 1]} : vector<8x128xf32> to vector<8x32xf32>
    %344 = math.tanh %343 : vector<8x32xf32>
    %345 = vector.extract_strided_slice %342 {offsets = [0, 0], sizes = [8, 32], strides = [1, 1]} : vector<8x96xf32> to vector<8x32xf32>
    %346 = vector.extract_strided_slice %342 {offsets = [0, 32], sizes = [8, 32], strides = [1, 1]} : vector<8x96xf32> to vector<8x32xf32>
    %347 = vector.extract_strided_slice %342 {offsets = [0, 64], sizes = [8, 32], strides = [1, 1]} : vector<8x96xf32> to vector<8x32xf32>
    %348 = arith.mulf %346, %309 : vector<8x32xf32>
    %349 = arith.mulf %345, %344 : vector<8x32xf32>
    %350 = arith.addf %348, %349 : vector<8x32xf32>
    %351 = math.tanh %350 : vector<8x32xf32>
    %352 = arith.mulf %347, %351 : vector<8x32xf32>
    %c56_92 = arith.constant 56 : index
    %c0_93 = arith.constant 0 : index
    %353 = vector.load %arg16[%c56_92, %c0_93] : memref<64x32xf32, #tpu.memory_space<vmem>>, vector<8x32xf32>
    tpu.vector_store %arg16[%c56_92, %c0_93], %352 {strides = array<i32>} : memref<64x32xf32, #tpu.memory_space<vmem>>, vector<8x32xf32>,
    %c0_94 = arith.constant 0 : index
    %c0_95 = arith.constant 0 : index
    %c0_96 = arith.constant 0 : index
    %354 = vector.load %arg13[%c0_94, %c0_95, %c0_96] : memref<2x8x32xf32, #tpu.memory_space<vmem>>, vector<1x8x32xf32>
    %355 = vector.shape_cast %354 : vector<1x8x32xf32> to vector<8x32xf32>
    %356 = vector.shape_cast %331 : vector<8x32xf32> to vector<1x8x32xf32>
    tpu.vector_store %arg13[%c0_94, %c0_95, %c0_96], %356 {strides = array<i32>} : memref<2x8x32xf32, #tpu.memory_space<vmem>>, vector<1x8x32xf32>,
    %c0_97 = arith.constant 0 : index
    %c0_98 = arith.constant 0 : index
    %c0_99 = arith.constant 0 : index
    %357 = vector.load %arg14[%c0_97, %c0_98, %c0_99] : memref<2x8x32xf32, #tpu.memory_space<vmem>>, vector<1x8x32xf32>
    %358 = vector.shape_cast %357 : vector<1x8x32xf32> to vector<8x32xf32>
    %359 = vector.shape_cast %329 : vector<8x32xf32> to vector<1x8x32xf32>
    tpu.vector_store %arg14[%c0_97, %c0_98, %c0_99], %359 {strides = array<i32>} : memref<2x8x32xf32, #tpu.memory_space<vmem>>, vector<1x8x32xf32>,
    %c1_100 = arith.constant 1 : index
    %c0_101 = arith.constant 0 : index
    %c0_102 = arith.constant 0 : index
    %360 = vector.load %arg13[%c1_100, %c0_101, %c0_102] : memref<2x8x32xf32, #tpu.memory_space<vmem>>, vector<1x8x32xf32>
    %361 = vector.shape_cast %360 : vector<1x8x32xf32> to vector<8x32xf32>
    %362 = vector.shape_cast %352 : vector<8x32xf32> to vector<1x8x32xf32>
    tpu.vector_store %arg13[%c1_100, %c0_101, %c0_102], %362 {strides = array<i32>} : memref<2x8x32xf32, #tpu.memory_space<vmem>>, vector<1x8x32xf32>,
    %c1_103 = arith.constant 1 : index
    %c0_104 = arith.constant 0 : index
    %c0_105 = arith.constant 0 : index
    %363 = vector.load %arg14[%c1_103, %c0_104, %c0_105] : memref<2x8x32xf32, #tpu.memory_space<vmem>>, vector<1x8x32xf32>
    %364 = vector.shape_cast %363 : vector<1x8x32xf32> to vector<8x32xf32>
    %365 = vector.shape_cast %350 : vector<8x32xf32> to vector<1x8x32xf32>
    tpu.vector_store %arg14[%c1_103, %c0_104, %c0_105], %365 {strides = array<i32>} : memref<2x8x32xf32, #tpu.memory_space<vmem>>, vector<1x8x32xf32>,
    %c0_106 = arith.constant 0 : index
    %c0_107 = arith.constant 0 : index
    %366 = vector.load %arg16[%c0_106, %c0_107] : memref<64x32xf32, #tpu.memory_space<vmem>>, vector<64x32xf32>
    %c0_108 = arith.constant 0 : index
    %c0_109 = arith.constant 0 : index
    %367 = vector.load %arg10[%c0_108, %c0_109] : memref<32x128xf32, #tpu.memory_space<vmem>>, vector<32x128xf32>
    %cst_110 = arith.constant dense<0.000000e+00> : vector<64x128xf32>
    %368 = tpu.matmul %366, %367, %cst_110 {dimension_numbers = #tpu.dot_dimension_numbers<[1], [0], [0], [1], [0, 0, 1, 1], [], []>} : vector<64x32xf32>, vector<32x128xf32>, vector<64x128xf32> -> vector<64x128xf32>
    %c0_111 = arith.constant 0 : index
    %c0_112 = arith.constant 0 : index
    %369 = vector.load %arg11[%c0_111, %c0_112] : memref<1x128xf32, #tpu.memory_space<vmem>>, vector<1x128xf32>
    %370 = vector.broadcast %369 : vector<1x128xf32> to vector<64x128xf32>
    %371 = arith.addf %368, %370 : vector<64x128xf32>
    %cst_113 = arith.constant 0.000000e+00 : f32
    %372 = vector.broadcast %cst_113 : f32 to vector<64x128xf32>
    %373 = arith.maximumf %371, %372 : vector<64x128xf32>
    %c0_114 = arith.constant 0 : index
    %c0_115 = arith.constant 0 : index
    %374 = vector.load %arg12[%c0_114, %c0_115] : memref<64x128xf32, #tpu.memory_space<vmem>>, vector<64x128xf32>
    tpu.vector_store %arg12[%c0_114, %c0_115], %373 {strides = array<i32>} : memref<64x128xf32, #tpu.memory_space<vmem>>, vector<64x128xf32>,
    return
  }
}

</mosaic_0001>

<bundles_post_ra>
// kernel: tpu_custom_call.1
= control target key start
LH: loop header
LB: loop body
LE: loop exit
PB: predicated region body
PF: predicated region fallthrough
CT: control target
= control target key end

     0   :  { %20 = vsyncpa [#allocation5], 0  ;;  %s4549_s0 = inlined_call_operand.vmem [shape: s32[64,1], index: 0, kind: input, shape index: {}]   ;;  %s4550_s1 = inlined_call_operand.vmem [shape: f32[32,16], index: 1, kind: input, shape index: {}]   ;;  %s4551_s2 = inlined_call_operand.hbm [shape: f32[2,8,32], index: 2, kind: input, shape index: {}]   ;;  %s4552_s3 = inlined_call_operand.hbm [shape: f32[2,8,32], index: 3, kind: input, shape index: {}]   ;;  %s4553_s4 = inlined_call_operand.hbm [shape: f32[16,128], index: 4, kind: input, shape index: {}]   ;;  %s4554_s5 = inlined_call_operand.vmem [shape: f32[32,128], index: 5, kind: input, shape index: {}]   ;;  %s4555_s6 = inlined_call_operand.vmem [shape: f32[1,128], index: 6, kind: input, shape index: {}]   ;;  %s4556_s7 = inlined_call_operand.vmem [shape: f32[32,128], index: 7, kind: input, shape index: {}]   ;;  %s4557_s8 = inlined_call_operand.vmem [shape: f32[32,128], index: 8, kind: input, shape index: {}]   ;;  %s4558_s9 = inlined_call_operand.vmem [shape: f32[1,128], index: 9, kind: input, shape index: {}]   ;;  %s4559_s10 = inlined_call_operand.vmem [shape: f32[32,128], index: 10, kind: input, shape index: {}]   ;;  %s4560_s11 = inlined_call_operand.vmem [shape: f32[1,128], index: 11, kind: input, shape index: {}]   ;;  %s4561_s12 = inlined_call_operand.hbm [shape: f32[64,128], index: 12, kind: output, shape index: {0}]   ;;  %s4562_s13 = inlined_call_operand.hbm [shape: f32[2,8,32], index: 13, kind: output, shape index: {1}]   ;;  %s4563_s14 = inlined_call_operand.hbm [shape: f32[2,8,32], index: 14, kind: output, shape index: {2}]  }
   0x1   :  { %21 = vsyncpa [#allocation8], 0 }
   0x2   :  { %22 = vsyncpa [#allocation6], 0 }
   0x3   :  { %23 = vsyncpa [#allocation12], 0  ;;  %s3876_s29 = smov [#allocation7]   ;;  %s3877_s15 = smov [#allocation4]  }
   0x4   :  { %s45_s30 = sshll.u32 %s3876_s29, 4  ;;  %s33_s16 = sshll.u32 %s3877_s15, 4  ;;  %s46_s30 = int_to_ptr.vmem [resolvable:$true] %s45_s30  ;;  %s3966_s16 = int_to_ptr.vmem [resolvable:$true] %s33_s16 }
   0x5   :  { %s3736_s19 = scalar_lea.hbm %s4552_s3, 256 }
   0x6   :  { %p3737_p0 = scmp.ne.s32.totalorder %s4552_s3, %s3736_s19  ;;  %p3740_p1 = scmp.lt.u32.totalorder %s3736_s19, %s4552_s3 }
   0x8   :  { %p3742_p2 = pnand %p3740_p1, %p3737_p0 }
   0xa   :  { %3745 = shalt.err (!%p3742_p2)
}
   0xb   :  { %s3746_s24 = scalar_lea.vmem %s46_s30, 256  ;;  %p3751_p4 = scmp.lt.s32.totalorder %s46_s30, %s46_s30 }
   0xc   :  { %p3747_p3 = scmp.ne.s32.totalorder %s46_s30, %s3746_s24  ;;  %p3752_p5 = scmp.lt.s32.totalorder %s3746_s24, %s3746_s24 }
   0xe   :  { %p3753_p6 = por %p3752_p5, %p3751_p4 }
  0x10   :  { %p3754_p7 = pnand %p3753_p6, %p3747_p3 }
  0x12   :  { %3757 = shalt.err (!%p3754_p7)
}
  0x13   :  { %s3878_s25 = smov 128   ;;  %s3879_s26 = smov 8  }
  0x14   :  { %51 = dma.hbm_to_vmem [thread:$0]  %s4552_s3, 256, %s46_s30, [#allocation8], %s3878_s25, %s3878_s25, %s3879_s26  }
  0x15   :  { %s3758_s17 = scalar_lea.hbm %s4551_s2, 256 }
  0x16   :  { %p3759_p8 = scmp.ne.s32.totalorder %s4551_s2, %s3758_s17  ;;  %p3762_p9 = scmp.lt.u32.totalorder %s3758_s17, %s4551_s2 }
  0x18   :  { %p3764_p10 = pnand %p3762_p9, %p3759_p8 }
  0x1a   :  { %3767 = shalt.err (!%p3764_p10)
}
  0x1b   :  { %s3768_s22 = scalar_lea.vmem %s3966_s16, 256  ;;  %p3773_p12 = scmp.lt.s32.totalorder %s3966_s16, %s3966_s16 }
  0x1c   :  { %p3769_p11 = scmp.ne.s32.totalorder %s3966_s16, %s3768_s22  ;;  %p3774_p13 = scmp.lt.s32.totalorder %s3768_s22, %s3768_s22 }
  0x1e   :  { %p3775_p0 = por %p3774_p13, %p3773_p12 }
  0x20   :  { %p3776_p1 = pnand %p3775_p0, %p3769_p11 }
  0x22   :  { %3779 = shalt.err (!%p3776_p1)
}
  0x23   :  { %39 = dma.hbm_to_vmem [thread:$0]  %s4551_s2, 256, %s3966_s16, [#allocation5], %s3878_s25, %s3878_s25, %s3879_s26  }
  0x24   :  { %s3880_s23 = smov [#allocation9]   ;;  %s3780_s29 = scalar_lea.hbm %s4553_s4, 256 }
  0x25   :  { %s57_s24 = sshll.u32 %s3880_s23, 4  ;;  %p3781_p2 = scmp.ne.s32.totalorder %s4553_s4, %s3780_s29  ;;  %s58_s24 = int_to_ptr.vmem [resolvable:$true] %s57_s24 }
  0x26   :  { %p3784_p3 = scmp.lt.u32.totalorder %s3780_s29, %s4553_s4 }
  0x28   :  { %p3786_p4 = pnand %p3784_p3, %p3781_p2 }
  0x2a   :  { %3789 = shalt.err (!%p3786_p4)
}
  0x2b   :  { %s3790_s20 = scalar_lea.vmem %s58_s24, 256  ;;  %p3795_p6 = scmp.lt.s32.totalorder %s58_s24, %s58_s24 }
  0x2c   :  { %p3791_p5 = scmp.ne.s32.totalorder %s58_s24, %s3790_s20  ;;  %p3796_p7 = scmp.lt.s32.totalorder %s3790_s20, %s3790_s20 }
  0x2e   :  { %p3797_p8 = por %p3796_p7, %p3795_p6 }
  0x30   :  { %p3798_p9 = pnand %p3797_p8, %p3791_p5 }
  0x32   :  { %3801 = shalt.err (!%p3798_p9)
}
  0x33   :  { %63 = dma.hbm_to_vmem [thread:$0]  %s4553_s4, 256, %s58_s24, [#allocation8], %s3878_s25, %s3878_s25, %s3879_s26  }
  0x34   :  { %3868 = dma.done.wait [#allocation5], 256  }
  0x35   :  { %3869 = vsyncadd [#allocation5], 4294967040 }
  0x36   :  { %3870 = dma.done.wait [#allocation8], 512  }
  0x37   :  { %3871 = vsyncadd [#allocation8], 4294966784  ;;  %v3881_v0 = vmov 0   ;;  %v89_v1 = vld [vmem:[%s4549_s0 + $0x10] sm:$0xff]  ;;  %v87_v2 = vld [vmem:[%s4549_s0] sm:$0xff]  ;;  %v95_v18 = vlaneseq  ;;  %vm149_vm0 = vcmask 261120  }
  0x38   :  { %3606 = vset.pattern.permute.xlu1 %v3881_v0  ;;  %3605 = vset.pattern.permute.xlu0 %v3881_v0  ;;  %v90_v3 = vld [vmem:[%s4549_s0 + $0x18] sm:$0xff]  ;;  %v88_v4 = vld [vmem:[%s4549_s0 + $0x8] sm:$0xff]  ;;  %v145_v5 = vld [vmem:[%s4550_s1] sm:$0xff]  ;;  %v3882_v22 = vmov 0.0   ;;  %v3883_v37 = vmov 0.0|0.0   ;;  %vm288_vm9 = vcmask 130048  }
  0x39   :  { %104 = vperm.xlu1 %3606, %v89_v1   ;;  %98 = vperm.xlu0 %3605, %v87_v2   ;;  %v146_v6 = vld [vmem:[%s4550_s1 + $0x8] sm:$0xff]  ;;  %v147_v7 = vld [vmem:[%s4550_s1 + $0x10] sm:$0xff]  ;;  %v148_v8 = vld [vmem:[%s4550_s1 + $0x18] sm:$0xff]  ;;  %v96_v19 = vand.u32 127, %v95_v18  ;;  %vm3885_vm10 = vmmov 0  }
  0x3a   :  { %v3424_v9 = vpack.c.bf16 %v146_v6, %v145_v5  ;;  %v3428_v10 = vpack.c.bf16 %v148_v8, %v147_v7  ;;  %v92_v11 = vld [vmem:[%s4549_s0 + $0x28] sm:$0xff]  ;;  %v91_v12 = vld [vmem:[%s4549_s0 + $0x20] sm:$0xff]  ;;  %v94_v13 = vld [vmem:[%s4549_s0 + $0x38] sm:$0xff] }
  0x3b   :  { %v93_v14 = vld [vmem:[%s4549_s0 + $0x30] sm:$0xff]  ;;  %v279_v15 = vld [vmem:[#allocation9] sm:$0xff]  ;;  %v280_v16 = vld [vmem:[#allocation9 + $0x8] sm:$0xff]  ;;  %s3884_s0 = smov 32  }
  0x3c   :  { %3425 = vmatprep.subr.bf16.mxu0 %v3424_v9  ;;  %v3432_v17 = vpack.c.bf16 %v280_v16, %v279_v15  ;;  %v442_v38 = vld [vmem:[#allocation7] sm:$0xff]  ;;  %v430_v43 = vld [vmem:[%s4554_s5] sm:$0xff]  ;;  %v431_v44 = vld [vmem:[%s4554_s5 + $0x8] sm:$0xff] }
  0x3d   :  { %107 = vperm.xlu1 %3606, %v90_v3   ;;  %101 = vperm.xlu0 %3605, %v88_v4   ;;  %v4083_v46 = vpack.c.bf16 %v431_v44, %v430_v43  ;;  %v432_v48 = vld [vmem:[%s4554_s5 + $0x10] sm:$0xff]  ;;  %v433_v49 = vld [vmem:[%s4554_s5 + $0x18] sm:$0xff]  ;;  %v439_v53 = vld [vmem:[#allocation4] sm:$0xff] }
  0x3e   :  { %3427 = vmatpush3.bf16.msra.mxu0 %v3424_v9  ;;  %3588 = vmatprep.subr.bf16.mxu1 %v3432_v17  ;;  %v4096_v51 = vpack.c.bf16 %v433_v49, %v432_v48  ;;  %v2891_v54 = vld [vmem:[%s4555_s6] ss:$0 sm:$0xff] }
  0x3f   :  { %3429 = vmatprep.subr.bf16.mxu0 %v3428_v10  ;;  %3589 = vmatpush3.bf16.msra.mxu1 %v3432_v17 }
  0x40   :  { %3436 = vmatprep.subr.bf16.mxu1 %v3883_v37 }
  0x41   :  { %113 = vperm.xlu1 %3606, %v92_v11   ;;  %110 = vperm.xlu0 %3605, %v91_v12  }
  0x42   :  { %3431 = vmatpush3.bf16.msra.mxu0 %v3428_v10 }
  0x43   :  { %3433 = vmatprep.subr.bf16.mxu0 %v3432_v17 }
  0x45   :  { %119 = vperm.xlu1 %3606, %v94_v13   ;;  %116 = vperm.xlu0 %3605, %v93_v14  }
  0x49   :  { %528 = vrot.lane.b32.xlu1 %v442_v38, %s3884_s0 }
  0xb8   :  { %v105_v20 = vpop.permute.xlu1 %104  ;;  %v99_v21 = vpop.permute.xlu0 %98 }
  0xb9   :  { %vm121_vm1 = vcmp.eq.s32.totalorder %v99_v21, %v96_v19  ;;  %vm123_vm2 = vcmp.eq.s32.totalorder %v105_v20, %v96_v19  ;;  %v434_v21 = vld [vmem:[%s4557_s8] sm:$0xff] }
  0xba   :  { %v2875_v23 = vsel %vm121_vm1, 1.0, %v3882_v22  ;;  %v2877_v26 = vsel %vm123_vm2, 1.0, %v3882_v22 }
  0xbb   :  { %3112 = vmatprep.mubr.msk.f32.mxu0 %vm149_vm0, %v2875_v23  ;;  %v435_v23 = vld [vmem:[%s4557_s8 + $0x8] sm:$0xff] }
  0xbc   :  { %v108_v24 = vpop.permute.xlu1 %107  ;;  %v102_v25 = vpop.permute.xlu0 %101 }
  0xbd   :  { %vm122_vm3 = vcmp.eq.s32.totalorder %v102_v25, %v96_v19  ;;  %vm124_vm4 = vcmp.eq.s32.totalorder %v108_v24, %v96_v19  ;;  %v436_v24 = vld [vmem:[%s4557_s8 + $0x10] sm:$0xff]  ;;  %v4139_v25 = vpack.c.bf16 %v435_v23, %v434_v21 }
  0xbe   :  { %v2876_v27 = vsel %vm122_vm3, 1.0, %v3882_v22  ;;  %v2878_v30 = vsel %vm124_vm4, 1.0, %v3882_v22 }
  0xbf   :  { %3113 = vmatmul.mubr.msk.f32.vlgmr.msra.gmra.mrb[0].mxu0 %vm149_vm0, %v2876_v27  ;;  %v426_v27 = vld [vmem:[%s4556_s7] sm:$0xff] }
  0xc0   :  { %v114_v28 = vpop.permute.xlu1 %113  ;;  %3115 = vmatprep.mubr.msk.f32.mxu0 %vm149_vm0, %v2877_v26  ;;  %v111_v29 = vpop.permute.xlu0 %110  ;;  %3435 = vmatpush3.bf16.msra.mxu0 %v3432_v17  ;;  %v437_v26 = vld [vmem:[%s4557_s8 + $0x18] sm:$0xff] }
  0xc1   :  { %vm125_vm5 = vcmp.eq.s32.totalorder %v111_v29, %v96_v19  ;;  %vm126_vm6 = vcmp.eq.s32.totalorder %v114_v28, %v96_v19  ;;  %3442 = vmatprep.subr.bf16.mxu0 %v3883_v37  ;;  %v427_v28 = vld [vmem:[%s4556_s7 + $0x8] sm:$0xff]  ;;  %v428_v29 = vld [vmem:[%s4556_s7 + $0x10] sm:$0xff] }
  0xc2   :  { %v2879_v31 = vsel %vm125_vm5, 1.0, %v3882_v22  ;;  %v2880_v34 = vsel %vm126_vm6, 1.0, %v3882_v22 }
  0xc3   :  { %3116 = vmatmul.mubr.msk.f32.gmra.mrb[2].mxu0 %vm149_vm0, %v2878_v30  ;;  %v429_v30 = vld [vmem:[%s4556_s7 + $0x18] sm:$0xff]  ;;  %s3886_s7 = smov 64  }
  0xc4   :  { %v120_v32 = vpop.permute.xlu1 %119  ;;  %3118 = vmatprep.mubr.msk.f32.mxu0 %vm149_vm0, %v2879_v31  ;;  %v117_v33 = vpop.permute.xlu0 %116  ;;  %v4157_v31 = vpack.c.bf16 %v437_v26, %v436_v24 }
  0xc5   :  { %vm127_vm7 = vcmp.eq.s32.totalorder %v117_v33, %v96_v19  ;;  %vm128_vm8 = vcmp.eq.s32.totalorder %v120_v32, %v96_v19  ;;  %v4159_v32 = vpack.c.bf16 %v427_v28, %v426_v27  ;;  %v4163_v33 = vpack.c.bf16 %v429_v30, %v428_v29 }
  0xc6   :  { %v2881_v35 = vsel %vm127_vm7, 1.0, %v3882_v22  ;;  %v2882_v36 = vsel %vm128_vm8, 1.0, %v3882_v22 }
  0xc7   :  { %3119 = vmatmul.mubr.msk.f32.gmra.mrb[4].mxu0 %vm149_vm0, %v2880_v34  ;;  %v441_v34 = vld [vmem:[#allocation4 + $0x8] sm:$0xff] }
  0xc8   :  { %3121 = vmatprep.mubr.msk.f32.mxu0 %vm149_vm0, %v2881_v35  ;;  %v529_v17 = vpop.permute.xlu1 %528 }
  0xcb   :  { %3122 = vmatmul.mubr.msk.f32.gmra.mrb[6].mxu0 %vm149_vm0, %v2882_v36 }
 0x192   :  { %v3114_v39 = vpop.f32.mrb[0].mxu0 }
 0x193   :  { %v240_v40 = vpop.f32.mrb[1].mxu0 }
 0x194   :  { %3128 = vmatprep.mubr.msk.f32.mxu0 %vm288_vm9, %v240_v40 }
 0x195   :  { %3129 = vmatmul.mubr.msk.f32.vlgmr.msra.gmra.mrb[8].mxu0 %vm288_vm9, %v3114_v39 }
 0x196   :  { %v3117_v41 = vpop.f32.mrb[2].mxu0  ;;  %3444 = vmatpush3.bf16.msra.mxu0 %v4139_v25 }
 0x197   :  { %v250_v42 = vpop.f32.mrb[3].mxu0  ;;  %3445 = vmatprep.subr.bf16.mxu0 %v3883_v37 }
 0x198   :  { %3131 = vmatprep.mubr.msk.f32.mxu0 %vm288_vm9, %v250_v42  ;;  %v4196_v42 = vld [vmem:[%s4558_s9] ss:$0 sm:$0xff] }
 0x199   :  { %3132 = vmatmul.mubr.msk.f32.gmra.mrb[10].mxu0 %vm288_vm9, %v3117_v41 }
 0x19a   :  { %v3120_v45 = vpop.f32.mrb[4].mxu0  ;;  %3159 = vmatprep.mubr.msk.f32.mxu0 %vm3885_vm10, %v3882_v22  ;;  %3447 = vmatpush3.bf16.msra.mxu0 %v4157_v31 }
 0x19b   :  { %v260_v47 = vpop.f32.mrb[5].mxu0  ;;  %3454 = vmatprep.subr.bf16.mxu0 %v3883_v37 }
 0x19c   :  { %3134 = vmatprep.mubr.msk.f32.mxu1 %vm288_vm9, %v260_v47 }
 0x19d   :  { %3135 = vmatmul.mubr.msk.f32.vlgmr.msra.gmra.mrb[0].mxu1 %vm288_vm9, %v3120_v45  ;;  %3160 = vmatmul.mubr.msk.f32.vlgmr.msra.gmra.mrb[12].mxu0 %vm149_vm0, %v441_v34 }
 0x19e   :  { %3438 = vmatpush3.bf16.msra.mxu1 %v4083_v46  ;;  %v3123_v50 = vpop.f32.mrb[6].mxu0  ;;  %3456 = vmatpush3.bf16.msra.mxu0 %v4083_v46 }
 0x19f   :  { %v270_v52 = vpop.f32.mrb[7].mxu0  ;;  %3439 = vmatprep.subr.bf16.mxu1 %v3883_v37  ;;  %3457 = vmatprep.subr.bf16.mxu0 %v3883_v37 }
 0x1a0   :  { %3137 = vmatprep.mubr.msk.f32.mxu1 %vm288_vm9, %v270_v52  ;;  %3181 = vmatprep.mubr.msk.f32.mxu0 %vm3885_vm10, %v3882_v22 }
 0x1a1   :  { %3138 = vmatmul.mubr.msk.f32.gmra.mrb[2].mxu1 %vm288_vm9, %v3123_v50 }
 0x1a2   :  { %3441 = vmatpush3.bf16.msra.mxu1 %v4096_v51  ;;  %3148 = vmatprep.mubr.msk.f32.mxu1 %vm3885_vm10, %v3882_v22 }
 0x1a3   :  { %3448 = vmatprep.subr.bf16.mxu1 %v3883_v37  ;;  %3459 = vmatpush3.bf16.msra.mxu0 %v4096_v51 }
 0x1a4   :  { %3466 = vmatprep.subr.bf16.mxu0 %v3883_v37 }
 0x1a5   :  { %3149 = vmatmul.mubr.msk.f32.vlgmr.msra.gmra.mrb[4].mxu1 %vm149_vm0, %v439_v53 }
 0x1a6   :  { %3170 = vmatprep.mubr.msk.f32.mxu1 %vm3885_vm10, %v3882_v22  ;;  %3450 = vmatpush3.bf16.msra.mxu1 %v4159_v32 }
 0x1a7   :  { %3451 = vmatprep.subr.bf16.mxu1 %v3883_v37 }
 0x1aa   :  { %3453 = vmatpush3.bf16.msra.mxu1 %v4163_v33 }
 0x1ab   :  { %3460 = vmatprep.subr.bf16.mxu1 %v3883_v37 }
 0x268   :  { %v3130_v55 = vpop.f32.mrb[8].mxu0 }
 0x269   :  { %v4111_v56 = vadd.f32 %v3130_v55, %v2891_v54  ;;  %v379_v57 = vpop.f32.mrb[9].mxu0 }
 0x26a   :  { %v380_v6 = vadd.f32 %v2891_v54, %v379_v57 }
 0x26c   :  { %v3133_v58 = vpop.f32.mrb[10].mxu0 }
 0x26d   :  { %v4113_v59 = vadd.f32 %v3133_v58, %v2891_v54  ;;  %v389_v60 = vpop.f32.mrb[11].mxu0 }
 0x26e   :  { %v4115_v61 = vadd.f32 %v2891_v54, %v389_v60 }
 0x270   :  { %v3136_v62 = vpop.f32.mrb[0].mxu1  ;;  %v617_v39 = vpop.f32.mrb[12].mxu0 }
 0x271   :  { %v4117_v63 = vadd.f32 %v3136_v62, %v2891_v54  ;;  %v399_v0 = vpop.f32.mrb[1].mxu1  ;;  %v3161_v40 = vpop.f32.mrb[13].mxu0 }
 0x272   :  { %v4119_v1 = vadd.f32 %v2891_v54, %v399_v0 }
 0x274   :  { %v3139_v2 = vpop.f32.mrb[2].mxu1 }
 0x275   :  { %v4121_v3 = vadd.f32 %v3139_v2, %v2891_v54  ;;  %v409_v4 = vpop.f32.mrb[3].mxu1 }
 0x276   :  { %v4123_v5 = vadd.f32 %v2891_v54, %v409_v4  ;;  %v444_v54 = vld [vmem:[#allocation7 + $0x8] sm:$0xff] }
 0x278   :  { %v515_v7 = vpop.f32.mrb[4].mxu1 }
 0x279   :  { %v519_v8 = vadd.f32 %v515_v7, %v380_v6  ;;  %v3150_v9 = vpop.f32.mrb[5].mxu1 }
 0x27b   :  { %3607 = vtanh.f32 %v519_v8  ;;  %v2901_v11 = vmul.f32 -1.442695, %v519_v8 }
 0x27d   :  { %3609 = vpow2.f32 %v2901_v11 }
 0x285   :  { %v3608_v10 = vpop.eup %3607 }
 0x286   :  { %533 = vrot.lane.b32.xlu0 %v3608_v10, %s3884_s0 }
 0x287   :  { %v3610_v12 = vpop.eup %3609 }
 0x288   :  { %v523_v13 = vadd.f32 1.0, %v3610_v12 }
 0x28a   :  { %3611 = vrcp.f32 %v523_v13 }
 0x294   :  { %v3612_v14 = vpop.eup %3611 }
 0x295   :  { %v531_v18 = vmul.f32 %v3612_v14, %v529_v17 }
 0x2f8   :  { %v534_v15 = vpop.permute.xlu0 %533 }
 0x2f9   :  { %v536_v16 = vmul.f32 %v3612_v14, %v534_v15 }
 0x2fb   :  { %538 = vrot.lane.b32.xlu0 %v536_v16, %s3884_s0 }
 0x36d   :  { %v539_v19 = vpop.permute.xlu0 %538 }
 0x36e   :  { %v4127_v20 = vadd.f32 %v539_v19, %v531_v18 }
 0x370   :  { %3613 = vtanh.f32 %v4127_v20 }
 0x37a   :  { %v3614_v35 = vpop.eup %3613 }
 0x37b   :  { %544 = vrot.lane.b32.xlu1 %v3614_v35, %s3884_s0 }
 0x3ed   :  { %v545_v36 = vpop.permute.xlu1 %544 }
 0x3ee   :  { %v547_v38 = vmul.f32 %v3612_v14, %v545_v36 }
 0x3f0   :  { %622 = vrot.lane.b32.xlu0 %v547_v38, %s3886_s7 }
 0x462   :  { %v623_v41 = vpop.permute.xlu0 %622 }
 0x463   :  { %3171 = vmatmul.mubr.msk.f32.vlgmr.msra.gmra.mrb[6].mxu1 %vm149_vm0, %v623_v41  ;;  %3182 = vmatmul.mubr.msk.f32.vlgmr.msra.gmra.mrb[14].mxu0 %vm149_vm0, %v623_v41 }
 0x464   :  { %3468 = vmatpush3.bf16.msra.mxu0 %v4159_v32  ;;  %3462 = vmatpush3.bf16.msra.mxu1 %v4139_v25 }
 0x465   :  { %3469 = vmatprep.subr.bf16.mxu0 %v3883_v37  ;;  %3463 = vmatprep.subr.bf16.mxu1 %v3883_v37 }
 0x466   :  { %3203 = vmatprep.mubr.msk.f32.mxu0 %vm3885_vm10, %v3882_v22  ;;  %3192 = vmatprep.mubr.msk.f32.mxu1 %vm3885_vm10, %v3882_v22 }
 0x468   :  { %3471 = vmatpush3.bf16.msra.mxu0 %v4163_v33  ;;  %3465 = vmatpush3.bf16.msra.mxu1 %v4157_v31 }
 0x469   :  { %3472 = vmatprep.subr.bf16.mxu1 %v3883_v37  ;;  %3478 = vmatprep.subr.bf16.mxu0 %v3883_v37 }
 0x536   :  { %v692_v43 = vpop.f32.mrb[6].mxu1  ;;  %v803_v44 = vpop.f32.mrb[14].mxu0 }
 0x537   :  { %v693_v45 = vadd.f32 %v692_v43, %v617_v39  ;;  %v807_v47 = vadd.f32 %v803_v44, %v4111_v56  ;;  %v3172_v48 = vpop.f32.mrb[7].mxu1  ;;  %v3183_v49 = vpop.f32.mrb[15].mxu0 }
 0x539   :  { %v702_v50 = vadd.f32 %v4196_v42, %v693_v45  ;;  %3615 = vtanh.f32 %v807_v47  ;;  %v2907_v55 = vmul.f32 -1.442695, %v807_v47 }
 0x53b   :  { %3617 = vtanh.f32 %v702_v50  ;;  %v2905_v57 = vmul.f32 -1.442695, %v702_v50 }
 0x53c   :  { %3619 = vpow2.f32 %v2907_v55 }
 0x53d   :  { %3621 = vpow2.f32 %v2905_v57 }
 0x543   :  { %v3616_v52 = vpop.eup %3615 }
 0x544   :  { %817 = vrot.lane.b32.xlu0 %v3616_v52, %s3884_s0 }
 0x545   :  { %v3618_v53 = vpop.eup %3617 }
 0x546   :  { %716 = vrot.lane.b32.xlu1 %v3618_v53, %s3884_s0  ;;  %v3620_v56 = vpop.eup %3619 }
 0x547   :  { %v3622_v58 = vpop.eup %3621  ;;  %v811_v60 = vadd.f32 1.0, %v3620_v56 }
 0x548   :  { %v706_v62 = vadd.f32 1.0, %v3622_v58 }
 0x549   :  { %3623 = vrcp.f32 %v811_v60 }
 0x54a   :  { %711 = vrot.lane.b32.xlu1 %v444_v54, %s3884_s0  ;;  %3625 = vrcp.f32 %v706_v62 }
 0x553   :  { %v3624_v0 = vpop.eup %3623 }
 0x554   :  { %v3626_v6 = vpop.eup %3625  ;;  %v815_v10 = vmul.f32 %v3624_v0, %v4127_v20 }
 0x5b6   :  { %v818_v2 = vpop.permute.xlu0 %817 }
 0x5b7   :  { %v820_v4 = vmul.f32 %v3624_v0, %v818_v2 }
 0x5b8   :  { %v717_v7 = vpop.permute.xlu1 %716 }
 0x5b9   :  { %v719_v8 = vmul.f32 %v3626_v6, %v717_v7  ;;  %822 = vrot.lane.b32.xlu1 %v820_v4, %s3884_s0 }
 0x5bb   :  { %721 = vrot.lane.b32.xlu0 %v719_v8, %s3884_s0 }
 0x5bc   :  { %v712_v9 = vpop.permute.xlu1 %711 }
 0x5bd   :  { %v714_v12 = vmul.f32 %v3626_v6, %v712_v9 }
 0x62b   :  { %v823_v11 = vpop.permute.xlu1 %822 }
 0x62c   :  { %v4206_v13 = vadd.f32 %v823_v11, %v815_v10 }
 0x62d   :  { %v722_v14 = vpop.permute.xlu0 %721 }
 0x62e   :  { %3627 = vtanh.f32 %v4206_v13  ;;  %v4209_v15 = vadd.f32 %v722_v14, %v714_v12 }
 0x630   :  { %3629 = vtanh.f32 %v4209_v15 }
 0x638   :  { %v3628_v16 = vpop.eup %3627 }
 0x639   :  { %828 = vrot.lane.b32.xlu1 %v3628_v16, %s3884_s0 }
 0x63a   :  { %v3630_v17 = vpop.eup %3629 }
 0x63b   :  { %727 = vrot.lane.b32.xlu0 %v3630_v17, %s3884_s0 }
 0x6ab   :  { %v829_v18 = vpop.permute.xlu1 %828 }
 0x6ac   :  { %v831_v19 = vmul.f32 %v3624_v0, %v829_v18 }
 0x6ad   :  { %v728_v20 = vpop.permute.xlu0 %727 }
 0x6ae   :  { %v730_v21 = vmul.f32 %v3626_v6, %v728_v20  ;;  %905 = vrot.lane.b32.xlu1 %v831_v19, %s3886_s7 }
 0x6b0   :  { %732 = vrot.lane.b32.xlu0 %v730_v21, %s3886_s7 }
 0x720   :  { %v906_v23 = vpop.permute.xlu1 %905 }
 0x721   :  { %3204 = vmatmul.mubr.msk.f32.vlgmr.msra.gmra.mrb[16].mxu0 %vm149_vm0, %v906_v23 }
 0x722   :  { %v733_v24 = vpop.permute.xlu0 %732  ;;  %3480 = vmatpush3.bf16.msra.mxu0 %v4139_v25  ;;  %3225 = vmatprep.mubr.msk.f32.mxu0 %vm3885_vm10, %v3882_v22 }
 0x723   :  { %735 = vst.msk [vmem:[#allocation3] sm:$0xff] %vm149_vm0, %v733_v24  ;;  %3193 = vmatmul.mubr.msk.f32.vlgmr.msra.gmra.mrb[8].mxu1 %vm149_vm0, %v733_v24  ;;  %3481 = vmatprep.subr.bf16.mxu0 %v3883_v37 }
 0x724   :  { %3474 = vmatpush3.bf16.msra.mxu1 %v4083_v46  ;;  %3214 = vmatprep.mubr.msk.f32.mxu1 %vm3885_vm10, %v3882_v22 }
 0x725   :  { %3475 = vmatprep.subr.bf16.mxu1 %v3883_v37 }
 0x726   :  { %3483 = vmatpush3.bf16.msra.mxu0 %v4157_v31 }
 0x727   :  { %3490 = vmatprep.subr.bf16.mxu0 %v3883_v37 }
 0x728   :  { %3477 = vmatpush3.bf16.msra.mxu1 %v4096_v51 }
 0x729   :  { %3484 = vmatprep.subr.bf16.mxu1 %v3883_v37 }
 0x72b   :  { %3215 = vmatmul.mubr.msk.f32.vlgmr.msra.gmra.mrb[10].mxu1 %vm149_vm0, %v906_v23 }
 0x72c   :  { %3486 = vmatpush3.bf16.msra.mxu1 %v4159_v32  ;;  %3236 = vmatprep.mubr.msk.f32.mxu1 %vm3885_vm10, %v3882_v22 }
 0x72d   :  { %3487 = vmatprep.subr.bf16.mxu1 %v3883_v37 }
 0x730   :  { %3489 = vmatpush3.bf16.msra.mxu1 %v4163_v33 }
 0x731   :  { %3496 = vmatprep.subr.bf16.mxu1 %v3883_v37 }
 0x7f4   :  { %v975_v26 = vpop.f32.mrb[16].mxu0 }
 0x7f5   :  { %v3205_v27 = vpop.f32.mrb[17].mxu0 }
 0x7f6   :  { %v900_v28 = vpop.f32.mrb[8].mxu1 }
 0x7f7   :  { %v976_v29 = vadd.f32 %v975_v26, %v900_v28  ;;  %v3194_v30 = vpop.f32.mrb[9].mxu1 }
 0x7f9   :  { %v979_v34 = vadd.f32 %v4196_v42, %v976_v29 }
 0x7fb   :  { %3631 = vtanh.f32 %v979_v34  ;;  %v2910_v41 = vmul.f32 -1.442695, %v979_v34 }
 0x7fe   :  { %v1076_v35 = vpop.f32.mrb[10].mxu1 }
 0x7ff   :  { %v1080_v36 = vadd.f32 %v1076_v35, %v4115_v61  ;;  %v3216_v38 = vpop.f32.mrb[11].mxu1 }
 0x801   :  { %3633 = vtanh.f32 %v1080_v36  ;;  %v2912_v43 = vmul.f32 -1.442695, %v1080_v36 }
 0x802   :  { %3635 = vpow2.f32 %v2910_v41 }
 0x803   :  { %3637 = vpow2.f32 %v2912_v43 }
 0x805   :  { %v3632_v39 = vpop.eup %3631 }
 0x806   :  { %989 = vrot.lane.b32.xlu0 %v3632_v39, %s3884_s0 }
 0x80b   :  { %v3634_v40 = vpop.eup %3633 }
 0x80c   :  { %1090 = vrot.lane.b32.xlu1 %v3634_v40, %s3884_s0  ;;  %v3636_v44 = vpop.eup %3635 }
 0x80d   :  { %v983_v45 = vadd.f32 1.0, %v3636_v44  ;;  %v3638_v47 = vpop.eup %3637 }
 0x80e   :  { %v1084_v48 = vadd.f32 1.0, %v3638_v47 }
 0x80f   :  { %3639 = vrcp.f32 %v983_v45 }
 0x810   :  { %3641 = vrcp.f32 %v1084_v48 }
 0x819   :  { %v3640_v49 = vpop.eup %3639 }
 0x81a   :  { %v3642_v52 = vpop.eup %3641  ;;  %v987_v55 = vmul.f32 %v3640_v49, %v4209_v15 }
 0x81b   :  { %v1088_v58 = vmul.f32 %v3642_v52, %v4206_v13 }
 0x878   :  { %v990_v61 = vpop.permute.xlu0 %989 }
 0x879   :  { %v992_v50 = vmul.f32 %v3640_v49, %v990_v61 }
 0x87b   :  { %994 = vrot.lane.b32.xlu0 %v992_v50, %s3884_s0 }
 0x87e   :  { %v1091_v53 = vpop.permute.xlu1 %1090 }
 0x87f   :  { %v1093_v54 = vmul.f32 %v3642_v52, %v1091_v53 }
 0x881   :  { %1095 = vrot.lane.b32.xlu1 %v1093_v54, %s3884_s0 }
 0x8ed   :  { %v995_v57 = vpop.permute.xlu0 %994 }
 0x8ee   :  { %v4245_v56 = vadd.f32 %v995_v57, %v987_v55 }
 0x8f0   :  { %3643 = vtanh.f32 %v4245_v56 }
 0x8f3   :  { %v1096_v60 = vpop.permute.xlu1 %1095 }
 0x8f4   :  { %v4249_v62 = vadd.f32 %v1096_v60, %v1088_v58 }
 0x8f6   :  { %3645 = vtanh.f32 %v4249_v62 }
 0x8fa   :  { %v3644_v0 = vpop.eup %3643 }
 0x8fb   :  { %1000 = vrot.lane.b32.xlu0 %v3644_v0, %s3884_s0 }
 0x900   :  { %v3646_v2 = vpop.eup %3645 }
 0x901   :  { %1101 = vrot.lane.b32.xlu1 %v3646_v2, %s3884_s0 }
 0x96d   :  { %v1001_v4 = vpop.permute.xlu0 %1000 }
 0x96e   :  { %v1003_v6 = vmul.f32 %v3640_v49, %v1001_v4 }
 0x970   :  { %1005 = vrot.lane.b32.xlu0 %v1003_v6, %s3886_s7 }
 0x973   :  { %v1102_v7 = vpop.permute.xlu1 %1101 }
 0x974   :  { %v1104_v8 = vmul.f32 %v3642_v52, %v1102_v7 }
 0x976   :  { %1178 = vrot.lane.b32.xlu1 %v1104_v8, %s3886_s7 }
 0x9e2   :  { %v1006_v9 = vpop.permute.xlu0 %1005 }
 0x9e3   :  { %1008 = vst.msk [vmem:[#allocation3 + $0x8] sm:$0xff] %vm149_vm0, %v1006_v9  ;;  %3226 = vmatmul.mubr.msk.f32.vlgmr.msra.gmra.mrb[18].mxu0 %vm149_vm0, %v1006_v9 }
 0x9e4   :  { %3492 = vmatpush3.bf16.msra.mxu0 %v4083_v46  ;;  %3247 = vmatprep.mubr.msk.f32.mxu0 %vm3885_vm10, %v3882_v22 }
 0x9e5   :  { %3493 = vmatprep.subr.bf16.mxu0 %v3883_v37 }
 0x9e8   :  { %3495 = vmatpush3.bf16.msra.mxu0 %v4096_v51  ;;  %v1179_v10 = vpop.permute.xlu1 %1178 }
 0x9e9   :  { %3237 = vmatmul.mubr.msk.f32.vlgmr.msra.gmra.mrb[12].mxu1 %vm149_vm0, %v1179_v10  ;;  %3502 = vmatprep.subr.bf16.mxu0 %v3883_v37 }
 0x9ea   :  { %3498 = vmatpush3.bf16.msra.mxu1 %v4139_v25  ;;  %3258 = vmatprep.mubr.msk.f32.mxu1 %vm3885_vm10, %v3882_v22 }
 0x9eb   :  { %3248 = vmatmul.mubr.msk.f32.vlgmr.msra.gmra.mrb[20].mxu0 %vm149_vm0, %v1179_v10  ;;  %3499 = vmatprep.subr.bf16.mxu1 %v3883_v37 }
 0x9ec   :  { %3504 = vmatpush3.bf16.msra.mxu0 %v4159_v32  ;;  %3269 = vmatprep.mubr.msk.f32.mxu0 %vm3885_vm10, %v3882_v22 }
 0x9ed   :  { %3505 = vmatprep.subr.bf16.mxu0 %v3883_v37 }
 0x9ee   :  { %3501 = vmatpush3.bf16.msra.mxu1 %v4157_v31 }
 0x9ef   :  { %3508 = vmatprep.subr.bf16.mxu1 %v3883_v37 }
 0x9f0   :  { %3507 = vmatpush3.bf16.msra.mxu0 %v4163_v33 }
 0x9f1   :  { %3514 = vmatprep.subr.bf16.mxu0 %v3883_v37 }
 0xab6   :  { %v1173_v11 = vpop.f32.mrb[18].mxu0 }
 0xab7   :  { %v3227_v12 = vpop.f32.mrb[19].mxu0 }
 0xabc   :  { %v1248_v13 = vpop.f32.mrb[12].mxu1 }
 0xabd   :  { %v1249_v14 = vadd.f32 %v1248_v13, %v1173_v11  ;;  %v3238_v15 = vpop.f32.mrb[13].mxu1 }
 0xabe   :  { %v1349_v16 = vpop.f32.mrb[20].mxu0 }
 0xabf   :  { %v1252_v17 = vadd.f32 %v4196_v42, %v1249_v14  ;;  %v1353_v18 = vadd.f32 %v1349_v16, %v4113_v59  ;;  %v3249_v19 = vpop.f32.mrb[21].mxu0 }
 0xac1   :  { %3647 = vtanh.f32 %v1252_v17  ;;  %v2915_v23 = vmul.f32 -1.442695, %v1252_v17  ;;  %v2917_v24 = vmul.f32 -1.442695, %v1353_v18 }
 0xac2   :  { %3649 = vtanh.f32 %v1353_v18 }
 0xac3   :  { %3651 = vpow2.f32 %v2915_v23 }
 0xac4   :  { %3653 = vpow2.f32 %v2917_v24 }
 0xacb   :  { %v3648_v20 = vpop.eup %3647 }
 0xacc   :  { %v3650_v21 = vpop.eup %3649  ;;  %1262 = vrot.lane.b32.xlu0 %v3648_v20, %s3884_s0 }
 0xacd   :  { %1363 = vrot.lane.b32.xlu1 %v3650_v21, %s3884_s0  ;;  %v3652_v26 = vpop.eup %3651 }
 0xace   :  { %v3654_v27 = vpop.eup %3653  ;;  %v1256_v28 = vadd.f32 1.0, %v3652_v26 }
 0xacf   :  { %v1357_v29 = vadd.f32 1.0, %v3654_v27 }
 0xad0   :  { %3655 = vrcp.f32 %v1256_v28 }
 0xad1   :  { %3657 = vrcp.f32 %v1357_v29 }
 0xada   :  { %v3656_v59 = vpop.eup %3655 }
 0xadb   :  { %v3658_v34 = vpop.eup %3657  ;;  %v1260_v39 = vmul.f32 %v3656_v59, %v4245_v56 }
 0xadc   :  { %v1361_v40 = vmul.f32 %v3658_v34, %v4249_v62 }
 0xb3e   :  { %v1263_v30 = vpop.permute.xlu0 %1262 }
 0xb3f   :  { %v1364_v35 = vpop.permute.xlu1 %1363  ;;  %v1265_v36 = vmul.f32 %v3656_v59, %v1263_v30 }
 0xb40   :  { %v1366_v38 = vmul.f32 %v3658_v34, %v1364_v35 }
 0xb41   :  { %1267 = vrot.lane.b32.xlu0 %v1265_v36, %s3884_s0 }
 0xb42   :  { %1368 = vrot.lane.b32.xlu1 %v1366_v38, %s3884_s0 }
 0xbb3   :  { %v1268_v41 = vpop.permute.xlu0 %1267 }
 0xbb4   :  { %v1369_v43 = vpop.permute.xlu1 %1368  ;;  %v4286_v44 = vadd.f32 %v1268_v41, %v1260_v39 }
 0xbb5   :  { %v4288_v45 = vadd.f32 %v1369_v43, %v1361_v40 }
 0xbb6   :  { %3659 = vtanh.f32 %v4286_v44 }
 0xbb7   :  { %3661 = vtanh.f32 %v4288_v45 }
 0xbc0   :  { %v3660_v47 = vpop.eup %3659 }
 0xbc1   :  { %v3662_v48 = vpop.eup %3661  ;;  %1273 = vrot.lane.b32.xlu0 %v3660_v47, %s3884_s0 }
 0xbc2   :  { %1374 = vrot.lane.b32.xlu1 %v3662_v48, %s3884_s0 }
 0xc33   :  { %v1274_v49 = vpop.permute.xlu0 %1273 }
 0xc34   :  { %v1375_v61 = vpop.permute.xlu1 %1374  ;;  %v1276_v50 = vmul.f32 %v3656_v59, %v1274_v49 }
 0xc35   :  { %v1377_v52 = vmul.f32 %v3658_v34, %v1375_v61 }
 0xc36   :  { %1278 = vrot.lane.b32.xlu0 %v1276_v50, %s3886_s7 }
 0xc37   :  { %1451 = vrot.lane.b32.xlu1 %v1377_v52, %s3886_s7 }
 0xca8   :  { %v1279_v53 = vpop.permute.xlu0 %1278 }
 0xca9   :  { %v1452_v54 = vpop.permute.xlu1 %1451  ;;  %1281 = vst.msk [vmem:[#allocation3 + $0x10] sm:$0xff] %vm149_vm0, %v1279_v53  ;;  %3259 = vmatmul.mubr.msk.f32.vlgmr.msra.gmra.mrb[14].mxu1 %vm149_vm0, %v1279_v53 }
 0xcaa   :  { %3270 = vmatmul.mubr.msk.f32.vlgmr.msra.gmra.mrb[22].mxu0 %vm149_vm0, %v1452_v54  ;;  %3510 = vmatpush3.bf16.msra.mxu1 %v4083_v46 }
 0xcab   :  { %3511 = vmatprep.subr.bf16.mxu1 %v3883_v37  ;;  %3280 = vmatprep.mubr.msk.f32.mxu1 %vm3885_vm10, %v3882_v22 }
 0xcac   :  { %3516 = vmatpush3.bf16.msra.mxu0 %v4139_v25  ;;  %3291 = vmatprep.mubr.msk.f32.mxu0 %vm3885_vm10, %v3882_v22 }
 0xcad   :  { %3517 = vmatprep.subr.bf16.mxu0 %v3883_v37 }
 0xcae   :  { %3513 = vmatpush3.bf16.msra.mxu1 %v4096_v51 }
 0xcaf   :  { %3520 = vmatprep.subr.bf16.mxu1 %v3883_v37 }
 0xcb0   :  { %3519 = vmatpush3.bf16.msra.mxu0 %v4157_v31 }
 0xcb1   :  { %3281 = vmatmul.mubr.msk.f32.vlgmr.msra.gmra.mrb[16].mxu1 %vm149_vm0, %v1452_v54  ;;  %3526 = vmatprep.subr.bf16.mxu0 %v3883_v37 }
 0xcb2   :  { %3522 = vmatpush3.bf16.msra.mxu1 %v4159_v32  ;;  %3302 = vmatprep.mubr.msk.f32.mxu1 %vm3885_vm10, %v3882_v22 }
 0xcb3   :  { %3523 = vmatprep.subr.bf16.mxu1 %v3883_v37 }
 0xcb6   :  { %3525 = vmatpush3.bf16.msra.mxu1 %v4163_v33 }
 0xcb7   :  { %3532 = vmatprep.subr.bf16.mxu1 %v3883_v37 }
 0xd7c   :  { %v1446_v55 = vpop.f32.mrb[14].mxu1 }
 0xd7d   :  { %v1521_v57 = vpop.f32.mrb[22].mxu0  ;;  %v3260_v56 = vpop.f32.mrb[15].mxu1 }
 0xd7e   :  { %v1522_v58 = vadd.f32 %v1521_v57, %v1446_v55  ;;  %v3271_v60 = vpop.f32.mrb[23].mxu0 }
 0xd80   :  { %v1525_v62 = vadd.f32 %v4196_v42, %v1522_v58 }
 0xd82   :  { %3663 = vtanh.f32 %v1525_v62  ;;  %v2920_v8 = vmul.f32 -1.442695, %v1525_v62 }
 0xd84   :  { %v1622_v0 = vpop.f32.mrb[16].mxu1 }
 0xd85   :  { %v1626_v2 = vadd.f32 %v1622_v0, %v4119_v1  ;;  %v3282_v4 = vpop.f32.mrb[17].mxu1 }
 0xd87   :  { %3665 = vtanh.f32 %v1626_v2  ;;  %v2922_v9 = vmul.f32 -1.442695, %v1626_v2 }
 0xd88   :  { %3667 = vpow2.f32 %v2920_v8 }
 0xd89   :  { %3669 = vpow2.f32 %v2922_v9 }
 0xd8c   :  { %v3664_v6 = vpop.eup %3663 }
 0xd8d   :  { %1535 = vrot.lane.b32.xlu0 %v3664_v6, %s3884_s0 }
 0xd91   :  { %v3666_v7 = vpop.eup %3665 }
 0xd92   :  { %1636 = vrot.lane.b32.xlu1 %v3666_v7, %s3884_s0  ;;  %v3668_v10 = vpop.eup %3667 }
 0xd93   :  { %v1529_v11 = vadd.f32 1.0, %v3668_v10  ;;  %v3670_v12 = vpop.eup %3669 }
 0xd94   :  { %v1630_v13 = vadd.f32 1.0, %v3670_v12 }
 0xd95   :  { %3671 = vrcp.f32 %v1529_v11 }
 0xd96   :  { %3673 = vrcp.f32 %v1630_v13 }
 0xd9f   :  { %v3672_v14 = vpop.eup %3671 }
 0xda0   :  { %v3674_v16 = vpop.eup %3673  ;;  %v1533_v19 = vmul.f32 %v3672_v14, %v4286_v44 }
 0xda1   :  { %v1634_v23 = vmul.f32 %v3674_v16, %v4288_v45 }
 0xdff   :  { %v1536_v1 = vpop.permute.xlu0 %1535 }
 0xe00   :  { %v1538_v15 = vmul.f32 %v3672_v14, %v1536_v1 }
 0xe02   :  { %1540 = vrot.lane.b32.xlu0 %v1538_v15, %s3884_s0 }
 0xe04   :  { %v1637_v17 = vpop.permute.xlu1 %1636 }
 0xe05   :  { %v1639_v18 = vmul.f32 %v3674_v16, %v1637_v17 }
 0xe07   :  { %1641 = vrot.lane.b32.xlu1 %v1639_v18, %s3884_s0 }
 0xe74   :  { %v1541_v20 = vpop.permute.xlu0 %1540 }
 0xe75   :  { %v4325_v21 = vadd.f32 %v1541_v20, %v1533_v19 }
 0xe77   :  { %3675 = vtanh.f32 %v4325_v21 }
 0xe79   :  { %v1642_v24 = vpop.permute.xlu1 %1641 }
 0xe7a   :  { %v4329_v26 = vadd.f32 %v1642_v24, %v1634_v23 }
 0xe7c   :  { %3677 = vtanh.f32 %v4329_v26 }
 0xe81   :  { %v3676_v27 = vpop.eup %3675 }
 0xe82   :  { %1546 = vrot.lane.b32.xlu0 %v3676_v27, %s3884_s0 }
 0xe86   :  { %v3678_v28 = vpop.eup %3677 }
 0xe87   :  { %1647 = vrot.lane.b32.xlu1 %v3678_v28, %s3884_s0 }
 0xef4   :  { %v1547_v29 = vpop.permute.xlu0 %1546 }
 0xef5   :  { %v1549_v59 = vmul.f32 %v3672_v14, %v1547_v29 }
 0xef7   :  { %1551 = vrot.lane.b32.xlu0 %v1549_v59, %s3886_s7 }
 0xef9   :  { %v1648_v30 = vpop.permute.xlu1 %1647 }
 0xefa   :  { %v1650_v34 = vmul.f32 %v3674_v16, %v1648_v30 }
 0xefc   :  { %1724 = vrot.lane.b32.xlu1 %v1650_v34, %s3886_s7 }
 0xf69   :  { %v1552_v35 = vpop.permute.xlu0 %1551 }
 0xf6a   :  { %1554 = vst.msk [vmem:[#allocation3 + $0x18] sm:$0xff] %vm149_vm0, %v1552_v35  ;;  %3292 = vmatmul.mubr.msk.f32.vlgmr.msra.gmra.mrb[24].mxu0 %vm149_vm0, %v1552_v35 }
 0xf6b   :  { %3528 = vmatpush3.bf16.msra.mxu0 %v4083_v46  ;;  %3313 = vmatprep.mubr.msk.f32.mxu0 %vm3885_vm10, %v3882_v22 }
 0xf6c   :  { %3529 = vmatprep.subr.bf16.mxu0 %v3883_v37 }
 0xf6e   :  { %v1725_v36 = vpop.permute.xlu1 %1724 }
 0xf6f   :  { %3531 = vmatpush3.bf16.msra.mxu0 %v4096_v51  ;;  %3303 = vmatmul.mubr.msk.f32.vlgmr.msra.gmra.mrb[18].mxu1 %vm149_vm0, %v1725_v36 }
 0xf70   :  { %3534 = vmatpush3.bf16.msra.mxu1 %v4139_v25  ;;  %3538 = vmatprep.subr.bf16.mxu0 %v3883_v37 }
 0xf71   :  { %3535 = vmatprep.subr.bf16.mxu1 %v3883_v37  ;;  %3324 = vmatprep.mubr.msk.f32.mxu1 %vm3885_vm10, %v3882_v22 }
 0xf72   :  { %3314 = vmatmul.mubr.msk.f32.vlgmr.msra.gmra.mrb[26].mxu0 %vm149_vm0, %v1725_v36 }
 0xf73   :  { %3540 = vmatpush3.bf16.msra.mxu0 %v4159_v32  ;;  %3335 = vmatprep.mubr.msk.f32.mxu0 %vm3885_vm10, %v3882_v22 }
 0xf74   :  { %3537 = vmatpush3.bf16.msra.mxu1 %v4157_v31  ;;  %3541 = vmatprep.subr.bf16.mxu0 %v3883_v37 }
 0xf75   :  { %3544 = vmatprep.subr.bf16.mxu1 %v3883_v37 }
 0xf77   :  { %3543 = vmatpush3.bf16.msra.mxu0 %v4163_v33 }
 0xf78   :  { %3550 = vmatprep.subr.bf16.mxu0 %v3883_v37 }
0x103d   :  { %v1719_v38 = vpop.f32.mrb[24].mxu0 }
0x103e   :  { %v3293_v39 = vpop.f32.mrb[25].mxu0 }
0x1042   :  { %v1794_v40 = vpop.f32.mrb[18].mxu1 }
0x1043   :  { %v1795_v41 = vadd.f32 %v1794_v40, %v1719_v38  ;;  %v3304_v43 = vpop.f32.mrb[19].mxu1 }
0x1045   :  { %v1798_v44 = vadd.f32 %v4196_v42, %v1795_v41  ;;  %v1895_v45 = vpop.f32.mrb[26].mxu0 }
0x1046   :  { %v1899_v47 = vadd.f32 %v1895_v45, %v4117_v63  ;;  %v3315_v48 = vpop.f32.mrb[27].mxu0 }
0x1047   :  { %3679 = vtanh.f32 %v1798_v44  ;;  %v2925_v50 = vmul.f32 -1.442695, %v1798_v44 }
0x1048   :  { %3681 = vtanh.f32 %v1899_v47  ;;  %v2927_v52 = vmul.f32 -1.442695, %v1899_v47 }
0x1049   :  { %3683 = vpow2.f32 %v2925_v50 }
0x104a   :  { %3685 = vpow2.f32 %v2927_v52 }
0x1051   :  { %v3680_v49 = vpop.eup %3679 }
0x1052   :  { %v3682_v61 = vpop.eup %3681  ;;  %1808 = vrot.lane.b32.xlu0 %v3680_v49, %s3884_s0 }
0x1053   :  { %1909 = vrot.lane.b32.xlu1 %v3682_v61, %s3884_s0  ;;  %v3684_v53 = vpop.eup %3683 }
0x1054   :  { %v3686_v54 = vpop.eup %3685  ;;  %v1802_v55 = vadd.f32 1.0, %v3684_v53 }
0x1055   :  { %v1903_v57 = vadd.f32 1.0, %v3686_v54 }
0x1056   :  { %3687 = vrcp.f32 %v1802_v55 }
0x1057   :  { %3689 = vrcp.f32 %v1903_v57 }
0x1060   :  { %v3688_v63 = vpop.eup %3687 }
0x1061   :  { %v3690_v58 = vpop.eup %3689  ;;  %v1806_v2 = vmul.f32 %v3688_v63, %v4325_v21 }
0x1062   :  { %v1907_v4 = vmul.f32 %v3690_v58, %v4329_v26 }
0x10c4   :  { %v1809_v56 = vpop.permute.xlu0 %1808 }
0x10c5   :  { %v1910_v60 = vpop.permute.xlu1 %1909  ;;  %v1811_v62 = vmul.f32 %v3688_v63, %v1809_v56 }
0x10c6   :  { %v1912_v0 = vmul.f32 %v3690_v58, %v1910_v60 }
0x10c7   :  { %1813 = vrot.lane.b32.xlu0 %v1811_v62, %s3884_s0 }
0x10c8   :  { %1914 = vrot.lane.b32.xlu1 %v1912_v0, %s3884_s0 }
0x1139   :  { %v1814_v6 = vpop.permute.xlu0 %1813 }
0x113a   :  { %v1915_v7 = vpop.permute.xlu1 %1914  ;;  %v4366_v8 = vadd.f32 %v1814_v6, %v1806_v2 }
0x113b   :  { %v4368_v9 = vadd.f32 %v1915_v7, %v1907_v4 }
0x113c   :  { %3691 = vtanh.f32 %v4366_v8 }
0x113d   :  { %3693 = vtanh.f32 %v4368_v9 }
0x1146   :  { %v3692_v10 = vpop.eup %3691 }
0x1147   :  { %v3694_v11 = vpop.eup %3693  ;;  %1819 = vrot.lane.b32.xlu0 %v3692_v10, %s3884_s0 }
0x1148   :  { %1920 = vrot.lane.b32.xlu1 %v3694_v11, %s3884_s0 }
0x11b9   :  { %v1820_v12 = vpop.permute.xlu0 %1819 }
0x11ba   :  { %v1921_v13 = vpop.permute.xlu1 %1920  ;;  %v1822_v14 = vmul.f32 %v3688_v63, %v1820_v12 }
0x11bb   :  { %v1923_v1 = vmul.f32 %v3690_v58, %v1921_v13 }
0x11bc   :  { %1824 = vrot.lane.b32.xlu0 %v1822_v14, %s3886_s7 }
0x11bd   :  { %1997 = vrot.lane.b32.xlu1 %v1923_v1, %s3886_s7 }
0x122e   :  { %v1825_v15 = vpop.permute.xlu0 %1824 }
0x122f   :  { %v1998_v16 = vpop.permute.xlu1 %1997  ;;  %1827 = vst.msk [vmem:[#allocation3 + $0x20] sm:$0xff] %vm149_vm0, %v1825_v15  ;;  %3325 = vmatmul.mubr.msk.f32.vlgmr.msra.gmra.mrb[20].mxu1 %vm149_vm0, %v1825_v15 }
0x1230   :  { %3336 = vmatmul.mubr.msk.f32.vlgmr.msra.gmra.mrb[28].mxu0 %vm149_vm0, %v1998_v16  ;;  %3546 = vmatpush3.bf16.msra.mxu1 %v4083_v46 }
0x1231   :  { %3547 = vmatprep.subr.bf16.mxu1 %v3883_v37  ;;  %3346 = vmatprep.mubr.msk.f32.mxu1 %vm3885_vm10, %v3882_v22 }
0x1232   :  { %3552 = vmatpush3.bf16.msra.mxu0 %v4139_v25  ;;  %3357 = vmatprep.mubr.msk.f32.mxu0 %vm3885_vm10, %v3882_v22 }
0x1233   :  { %3553 = vmatprep.subr.bf16.mxu0 %v3883_v37 }
0x1234   :  { %3549 = vmatpush3.bf16.msra.mxu1 %v4096_v51 }
0x1235   :  { %3556 = vmatprep.subr.bf16.mxu1 %v3883_v37 }
0x1236   :  { %3555 = vmatpush3.bf16.msra.mxu0 %v4157_v31 }
0x1237   :  { %3347 = vmatmul.mubr.msk.f32.vlgmr.msra.gmra.mrb[22].mxu1 %vm149_vm0, %v1998_v16  ;;  %3562 = vmatprep.subr.bf16.mxu0 %v3883_v37 }
0x1238   :  { %3558 = vmatpush3.bf16.msra.mxu1 %v4159_v32  ;;  %3368 = vmatprep.mubr.msk.f32.mxu1 %vm3885_vm10, %v3882_v22 }
0x1239   :  { %3559 = vmatprep.subr.bf16.mxu1 %v3883_v37 }
0x123c   :  { %3561 = vmatpush3.bf16.msra.mxu1 %v4163_v33 }
0x123d   :  { %3568 = vmatprep.subr.bf16.mxu1 %v3883_v37 }
0x1302   :  { %v1992_v17 = vpop.f32.mrb[20].mxu1 }
0x1303   :  { %v2067_v18 = vpop.f32.mrb[28].mxu0  ;;  %v3326_v19 = vpop.f32.mrb[21].mxu1 }
0x1304   :  { %v2068_v20 = vadd.f32 %v2067_v18, %v1992_v17  ;;  %v3337_v21 = vpop.f32.mrb[29].mxu0 }
0x1305   :  { %v2670_v21 = vld [vmem:[%s4559_s10] sm:$0xff] }
0x1306   :  { %v2071_v23 = vadd.f32 %v4196_v42, %v2068_v20 }
0x1308   :  { %3695 = vtanh.f32 %v2071_v23  ;;  %v2930_v59 = vmul.f32 -1.442695, %v2071_v23  ;;  %v2671_v23 = vld [vmem:[%s4559_s10 + $0x8] sm:$0xff] }
0x130a   :  { %v2168_v24 = vpop.f32.mrb[22].mxu1 }
0x130b   :  { %v2172_v26 = vadd.f32 %v2168_v24, %v4123_v5  ;;  %v3348_v27 = vpop.f32.mrb[23].mxu1  ;;  %v3580_v24 = vpack.c.bf16 %v2671_v23, %v2670_v21 }
0x130d   :  { %3697 = vtanh.f32 %v2172_v26  ;;  %v2932_v30 = vmul.f32 -1.442695, %v2172_v26 }
0x130e   :  { %3699 = vpow2.f32 %v2930_v59  ;;  %v2672_v59 = vld [vmem:[%s4559_s10 + $0x10] sm:$0xff] }
0x130f   :  { %3701 = vpow2.f32 %v2932_v30  ;;  %v2673_v30 = vld [vmem:[%s4559_s10 + $0x18] sm:$0xff] }
0x1312   :  { %v3696_v28 = vpop.eup %3695 }
0x1313   :  { %2081 = vrot.lane.b32.xlu0 %v3696_v28, %s3884_s0 }
0x1317   :  { %v3698_v29 = vpop.eup %3697 }
0x1318   :  { %2182 = vrot.lane.b32.xlu1 %v3698_v29, %s3884_s0  ;;  %v3700_v34 = vpop.eup %3699 }
0x1319   :  { %v2075_v35 = vadd.f32 1.0, %v3700_v34  ;;  %v3702_v36 = vpop.eup %3701  ;;  %v3584_v34 = vpack.c.bf16 %v2673_v30, %v2672_v59 }
0x131a   :  { %v2176_v38 = vadd.f32 1.0, %v3702_v36 }
0x131b   :  { %3703 = vrcp.f32 %v2075_v35 }
0x131c   :  { %3705 = vrcp.f32 %v2176_v38  ;;  %v2662_v38 = vld [vmem:[#allocation3] sm:$0xff] }
0x1325   :  { %v3704_v39 = vpop.eup %3703 }
0x1326   :  { %v3706_v41 = vpop.eup %3705  ;;  %v2079_v45 = vmul.f32 %v3704_v39, %v4366_v8 }
0x1327   :  { %v2180_v49 = vmul.f32 %v3706_v41, %v4368_v9 }
0x1385   :  { %v2082_v5 = vpop.permute.xlu0 %2081 }
0x1386   :  { %v2084_v40 = vmul.f32 %v3704_v39, %v2082_v5  ;;  %v2664_v5 = vld [vmem:[#allocation3 + $0x10] sm:$0xff] }
0x1388   :  { %2086 = vrot.lane.b32.xlu0 %v2084_v40, %s3884_s0  ;;  %v2665_v40 = vld [vmem:[#allocation3 + $0x18] sm:$0xff] }
0x138a   :  { %v2183_v43 = vpop.permute.xlu1 %2182 }
0x138b   :  { %v2185_v44 = vmul.f32 %v3706_v41, %v2183_v43 }
0x138d   :  { %2187 = vrot.lane.b32.xlu1 %v2185_v44, %s3884_s0 }
0x13fa   :  { %v2087_v47 = vpop.permute.xlu0 %2086 }
0x13fb   :  { %v4405_v48 = vadd.f32 %v2087_v47, %v2079_v45 }
0x13fd   :  { %3707 = vtanh.f32 %v4405_v48 }
0x13ff   :  { %v2188_v61 = vpop.permute.xlu1 %2187 }
0x1400   :  { %v4409_v50 = vadd.f32 %v2188_v61, %v2180_v49 }
0x1402   :  { %3709 = vtanh.f32 %v4409_v50 }
0x1407   :  { %v3708_v52 = vpop.eup %3707 }
0x1408   :  { %2092 = vrot.lane.b32.xlu0 %v3708_v52, %s3884_s0 }
0x140c   :  { %v3710_v53 = vpop.eup %3709 }
0x140d   :  { %2193 = vrot.lane.b32.xlu1 %v3710_v53, %s3884_s0  ;;  %v4483_v53 = vld [vmem:[%s4560_s11] ss:$0 sm:$0xff]  ;;  %s3888_s11 = smov [#allocation11]  }
0x147a   :  { %v2093_v54 = vpop.permute.xlu0 %2092 }
0x147b   :  { %v2095_v55 = vmul.f32 %v3704_v39, %v2093_v54  ;;  %v2663_v39 = vld [vmem:[#allocation3 + $0x8] sm:$0xff] }
0x147d   :  { %2097 = vrot.lane.b32.xlu0 %v2095_v55, %s3886_s7 }
0x147f   :  { %v2194_v57 = vpop.permute.xlu1 %2193 }
0x1480   :  { %v2196_v63 = vmul.f32 %v3706_v41, %v2194_v57  ;;  %v2666_v41 = vld [vmem:[#allocation3 + $0x20] sm:$0xff] }
0x1482   :  { %2270 = vrot.lane.b32.xlu1 %v2196_v63, %s3886_s7 }
0x14ef   :  { %v2098_v56 = vpop.permute.xlu0 %2097 }
0x14f0   :  { %2100 = vst.msk [vmem:[#allocation3 + $0x28] sm:$0xff] %vm149_vm0, %v2098_v56  ;;  %3358 = vmatmul.mubr.msk.f32.vlgmr.msra.gmra.mrb[30].mxu0 %vm149_vm0, %v2098_v56 }
0x14f1   :  { %3564 = vmatpush3.bf16.msra.mxu0 %v4083_v46  ;;  %3379 = vmatprep.mubr.msk.f32.mxu0 %vm3885_vm10, %v3882_v22 }
0x14f2   :  { %3565 = vmatprep.subr.bf16.mxu0 %v3883_v37 }
0x14f4   :  { %v2271_v58 = vpop.permute.xlu1 %2270 }
0x14f5   :  { %3567 = vmatpush3.bf16.msra.mxu0 %v4096_v51  ;;  %3369 = vmatmul.mubr.msk.f32.vlgmr.msra.gmra.mrb[24].mxu1 %vm149_vm0, %v2271_v58 }
0x14f6   :  { %3570 = vmatpush3.bf16.msra.mxu1 %v4139_v25  ;;  %3574 = vmatprep.subr.bf16.mxu0 %v3883_v37 }
0x14f7   :  { %3571 = vmatprep.subr.bf16.mxu1 %v3883_v37  ;;  %3390 = vmatprep.mubr.msk.f32.mxu1 %vm3885_vm10, %v3882_v22  ;;  %v2667_v43 = vld [vmem:[#allocation3 + $0x28] sm:$0xff] }
0x14f8   :  { %3380 = vmatmul.mubr.msk.f32.vlgmr.msra.gmra.mrb[32].mxu0 %vm149_vm0, %v2271_v58 }
0x14f9   :  { %3576 = vmatpush3.bf16.msra.mxu0 %v4159_v32  ;;  %3401 = vmatprep.mubr.msk.f32.mxu0 %vm3885_vm10, %v3882_v22 }
0x14fa   :  { %3573 = vmatpush3.bf16.msra.mxu1 %v4157_v31  ;;  %3577 = vmatprep.subr.bf16.mxu0 %v3883_v37 }
0x14fb   :  { %3581 = vmatprep.subr.bf16.mxu1 %v3580_v24 }
0x14fd   :  { %3579 = vmatpush3.bf16.msra.mxu0 %v4163_v33 }
0x15c3   :  { %v2265_v46 = vpop.f32.mrb[30].mxu0 }
0x15c4   :  { %v3359_v51 = vpop.f32.mrb[31].mxu0 }
0x15c8   :  { %v2340_v25 = vpop.f32.mrb[24].mxu1 }
0x15c9   :  { %v2341_v60 = vadd.f32 %v2340_v25, %v2265_v46  ;;  %v3370_v62 = vpop.f32.mrb[25].mxu1 }
0x15cb   :  { %v2344_v0 = vadd.f32 %v4196_v42, %v2341_v60  ;;  %v2441_v2 = vpop.f32.mrb[32].mxu0 }
0x15cc   :  { %v2445_v4 = vadd.f32 %v2441_v2, %v4121_v3  ;;  %v3381_v32 = vpop.f32.mrb[33].mxu0 }
0x15cd   :  { %3711 = vtanh.f32 %v2344_v0  ;;  %v2935_v37 = vmul.f32 -1.442695, %v2344_v0 }
0x15ce   :  { %3713 = vtanh.f32 %v2445_v4  ;;  %v2937_v31 = vmul.f32 -1.442695, %v2445_v4 }
0x15cf   :  { %3715 = vpow2.f32 %v2935_v37 }
0x15d0   :  { %3717 = vpow2.f32 %v2937_v31 }
0x15d7   :  { %v3712_v22 = vpop.eup %3711 }
0x15d8   :  { %v3714_v6 = vpop.eup %3713  ;;  %2354 = vrot.lane.b32.xlu0 %v3712_v22, %s3884_s0 }
0x15d9   :  { %2455 = vrot.lane.b32.xlu1 %v3714_v6, %s3884_s0  ;;  %v3716_v33 = vpop.eup %3715 }
0x15da   :  { %v3718_v7 = vpop.eup %3717  ;;  %v2348_v8 = vadd.f32 1.0, %v3716_v33 }
0x15db   :  { %v2449_v42 = vadd.f32 1.0, %v3718_v7 }
0x15dc   :  { %3719 = vrcp.f32 %v2348_v8 }
0x15dd   :  { %3721 = vrcp.f32 %v2449_v42 }
0x15e6   :  { %v3720_v3 = vpop.eup %3719 }
0x15e7   :  { %v3722_v10 = vpop.eup %3721  ;;  %v2352_v14 = vmul.f32 %v3720_v3, %v4405_v48 }
0x15e8   :  { %v2453_v1 = vmul.f32 %v3722_v10, %v4409_v50  ;;  %v3735_v50 = vld [vmem:[%s4558_s9] ss:$0 sm:$0xff]  ;;  %s3887_s9 = smov 96  }
0x164a   :  { %v2355_v9 = vpop.permute.xlu0 %2354 }
0x164b   :  { %v2456_v11 = vpop.permute.xlu1 %2455  ;;  %v2357_v12 = vmul.f32 %v3720_v3, %v2355_v9 }
0x164c   :  { %v2458_v13 = vmul.f32 %v3722_v10, %v2456_v11 }
0x164d   :  { %2359 = vrot.lane.b32.xlu0 %v2357_v12, %s3884_s0 }
0x164e   :  { %2460 = vrot.lane.b32.xlu1 %v2458_v13, %s3884_s0 }
0x16bf   :  { %v2360_v15 = vpop.permute.xlu0 %2359 }
0x16c0   :  { %v2461_v16 = vpop.permute.xlu1 %2460  ;;  %v4444_v17 = vadd.f32 %v2360_v15, %v2352_v14 }
0x16c1   :  { %v4446_v18 = vadd.f32 %v2461_v16, %v2453_v1 }
0x16c2   :  { %3723 = vtanh.f32 %v4444_v17 }
0x16c3   :  { %3725 = vtanh.f32 %v4446_v18 }
0x16cc   :  { %v3724_v19 = vpop.eup %3723 }
0x16cd   :  { %v3726_v20 = vpop.eup %3725  ;;  %2365 = vrot.lane.b32.xlu0 %v3724_v19, %s3884_s0 }
0x16ce   :  { %2466 = vrot.lane.b32.xlu1 %v3726_v20, %s3884_s0 }
0x173f   :  { %v2366_v26 = vpop.permute.xlu0 %2365 }
0x1740   :  { %v2467_v27 = vpop.permute.xlu1 %2466  ;;  %v2368_v28 = vmul.f32 %v3720_v3, %v2366_v26 }
0x1741   :  { %v2469_v29 = vmul.f32 %v3722_v10, %v2467_v27 }
0x1742   :  { %2370 = vrot.lane.b32.xlu0 %v2368_v28, %s3886_s7 }
0x1743   :  { %2543 = vrot.lane.b32.xlu1 %v2469_v29, %s3886_s7 }
0x17b4   :  { %v2371_v35 = vpop.permute.xlu0 %2370 }
0x17b5   :  { %v2544_v36 = vpop.permute.xlu1 %2543  ;;  %2373 = vst.msk [vmem:[#allocation3 + $0x30] sm:$0xff] %vm149_vm0, %v2371_v35  ;;  %3391 = vmatmul.mubr.msk.f32.vlgmr.msra.gmra.mrb[26].mxu1 %vm149_vm0, %v2371_v35 }
0x17b6   :  { %2648 = vst.msk [vmem:[#allocation11] sm:$0xff] %vm149_vm0, %v2544_v36  ;;  %3402 = vmatmul.mubr.msk.f32.vlgmr.msra.gmra.mrb[34].mxu0 %vm149_vm0, %v2544_v36  ;;  %3583 = vmatpush3.bf16.msra.mxu1 %v3580_v24 }
0x17b7   :  { %3412 = vmatprep.mubr.msk.f32.mxu1 %vm149_vm0, %v2662_v38  ;;  %3585 = vmatprep.subr.bf16.mxu1 %v3584_v34 }
0x17ba   :  { %3587 = vmatpush3.bf16.msra.mxu1 %v3584_v34 }
0x17bc   :  { %v2668_v44 = vld [vmem:[#allocation3 + $0x30] sm:$0xff] }
0x17bd   :  { %3413 = vmatmul.mubr.msk.f32.vlgmr.msra.gmra.mrb[28].mxu1 %vm149_vm0, %v2663_v39 }
0x17be   :  { %3415 = vmatprep.mubr.msk.f32.mxu1 %vm149_vm0, %v2664_v5 }
0x17c1   :  { %3416 = vmatmul.mubr.msk.f32.gmra.mrb[30].mxu1 %vm149_vm0, %v2665_v40 }
0x17c2   :  { %3418 = vmatprep.mubr.msk.f32.mxu1 %vm149_vm0, %v2666_v41 }
0x17c5   :  { %3419 = vmatmul.mubr.msk.f32.gmra.mrb[32].mxu1 %vm149_vm0, %v2667_v43 }
0x17c6   :  { %3421 = vmatprep.mubr.msk.f32.mxu1 %vm149_vm0, %v2668_v44 }
0x1888   :  { %v2538_v45 = vpop.f32.mrb[26].mxu1 }
0x1889   :  { %v2613_v47 = vpop.f32.mrb[34].mxu0  ;;  %v3392_v48 = vpop.f32.mrb[27].mxu1 }
0x188a   :  { %v2614_v49 = vadd.f32 %v2613_v47, %v2538_v45  ;;  %v3403_v61 = vpop.f32.mrb[35].mxu0 }
0x188c   :  { %v2617_v52 = vadd.f32 %v3735_v50, %v2614_v49 }
0x188e   :  { %3727 = vtanh.f32 %v2617_v52  ;;  %v2940_v33 = vmul.f32 -1.442695, %v2617_v52 }
0x1890   :  { %v3414_v54 = vpop.f32.mrb[28].mxu1  ;;  %3729 = vpow2.f32 %v2940_v33 }
0x1891   :  { %v2777_v55 = vadd.f32 %v3414_v54, %v4483_v53  ;;  %v2771_v57 = vpop.f32.mrb[29].mxu1 }
0x1892   :  { %v2772_v63 = vadd.f32 %v4483_v53, %v2771_v57 }
0x1893   :  { %v2811_v56 = vmax.f32 %v2777_v55, 0.0 }
0x1894   :  { %v2810_v58 = vmax.f32 %v2772_v63, 0.0  ;;  %v3417_v46 = vpop.f32.mrb[30].mxu1 }
0x1895   :  { %2819 = vst [vmem:[#allocation10 + $0x8] sm:$0xff] %v2811_v56  ;;  %v2787_v51 = vadd.f32 %v3417_v46, %v4483_v53  ;;  %v2781_v25 = vpop.f32.mrb[31].mxu1 }
0x1896   :  { %2818 = vst [vmem:[#allocation10] sm:$0xff] %v2810_v58  ;;  %v2782_v60 = vadd.f32 %v4483_v53, %v2781_v25 }
0x1897   :  { %v2813_v62 = vmax.f32 %v2787_v51, 0.0 }
0x1898   :  { %v3728_v0 = vpop.eup %3727  ;;  %v2812_v2 = vmax.f32 %v2782_v60, 0.0  ;;  %v3420_v4 = vpop.f32.mrb[32].mxu1 }
0x1899   :  { %2821 = vst [vmem:[#allocation10 + $0x18] sm:$0xff] %v2813_v62  ;;  %v2797_v32 = vadd.f32 %v3420_v4, %v4483_v53  ;;  %2627 = vrot.lane.b32.xlu0 %v3728_v0, %s3884_s0  ;;  %v2791_v22 = vpop.f32.mrb[33].mxu1 }
0x189a   :  { %2820 = vst [vmem:[#allocation10 + $0x10] sm:$0xff] %v2812_v2  ;;  %v2792_v6 = vadd.f32 %v4483_v53, %v2791_v22  ;;  %v3730_v7 = vpop.eup %3729 }
0x189b   :  { %v2815_v37 = vmax.f32 %v2797_v32, 0.0  ;;  %v2621_v8 = vadd.f32 1.0, %v3730_v7 }
0x189c   :  { %v2814_v31 = vmax.f32 %v2792_v6, 0.0 }
0x189d   :  { %2823 = vst [vmem:[#allocation10 + $0x28] sm:$0xff] %v2815_v37  ;;  %3731 = vrcp.f32 %v2621_v8 }
0x189e   :  { %2822 = vst [vmem:[#allocation10 + $0x20] sm:$0xff] %v2814_v31 }
0x18a7   :  { %v3732_v42 = vpop.eup %3731 }
0x18a8   :  { %v2625_v10 = vmul.f32 %v3732_v42, %v4444_v17 }
0x190b   :  { %v2628_v3 = vpop.permute.xlu0 %2627 }
0x190c   :  { %v2630_v9 = vmul.f32 %v3732_v42, %v2628_v3 }
0x190e   :  { %2632 = vrot.lane.b32.xlu1 %v2630_v9, %s3884_s0 }
0x1980   :  { %v2633_v11 = vpop.permute.xlu1 %2632 }
0x1981   :  { %v2635_v12 = vadd.f32 %v2633_v11, %v2625_v10 }
0x1983   :  { %3733 = vtanh.f32 %v2635_v12 }
0x198d   :  { %v3734_v13 = vpop.eup %3733 }
0x198e   :  { %2638 = vrot.lane.b32.xlu0 %v3734_v13, %s3884_s0  ;;  %s2843_s0 = sshll.u32 %s3888_s11, 4  ;;  %s2844_s0 = int_to_ptr.vmem [resolvable:$true] %s2843_s0 }
0x198f   :  { %s3802_s1 = scalar_lea.vmem %s2844_s0, 256  ;;  %p3807_p11 = scmp.lt.s32.totalorder %s2844_s0, %s2844_s0 }
0x1990   :  { %p3803_p10 = scmp.ne.s32.totalorder %s2844_s0, %s3802_s1  ;;  %p3808_p12 = scmp.lt.s32.totalorder %s3802_s1, %s3802_s1 }
0x1992   :  { %2650 = vrot.lane.b32.xlu0 %v4446_v18, %s3887_s9  ;;  %p3809_p13 = por %p3808_p12, %p3807_p11 }
0x1994   :  { %p3810_p0 = pnand %p3809_p13, %p3803_p10 }
0x1a00   :  { %v2639_v14 = vpop.permute.xlu0 %2638 }
0x1a01   :  { %v2641_v1 = vmul.f32 %v3732_v42, %v2639_v14 }
0x1a03   :  { %2643 = vrot.lane.b32.xlu1 %v2641_v1, %s3886_s7 }
0x1a04   :  { %v2651_v15 = vpop.permute.xlu0 %2650 }
0x1a05   :  { %2653 = vst.msk [vmem:[#allocation13] sm:$0xff] %vm149_vm0, %v2651_v15 }
0x1a07   :  { %2657 = vrot.lane.b32.xlu1 %v2635_v12, %s3887_s9 }
0x1a75   :  { %v2644_v16 = vpop.permute.xlu1 %2643 }
0x1a76   :  { %2646 = vst.msk [vmem:[#allocation3 + $0x38] sm:$0xff] %vm149_vm0, %v2644_v16  ;;  %2655 = vst.msk [vmem:[#allocation11 + $0x8] sm:$0xff] %vm149_vm0, %v2644_v16 }
0x1a79   :  { %v2658_v17 = vpop.permute.xlu1 %2657 }
0x1a7a   :  { %2661 = vst.msk [vmem:[#allocation13 + $0x8] sm:$0xff] %vm149_vm0, %v2658_v17 }
0x1a7d   :  { %v2669_v19 = vld [vmem:[#allocation3 + $0x38] sm:$0xff] }
0x1a7e   :  { %3422 = vmatmul.mubr.msk.f32.gmra.mrb[34].mxu1 %vm149_vm0, %v2669_v19 }
0x1a7f   :  { %3813 = shalt.err (!%p3810_p0)
}
0x1a80   :  { %s3814_s24 = scalar_lea.hbm %s4562_s13, 256 }
0x1a81   :  { %p3815_p1 = scmp.ne.s32.totalorder %s4562_s13, %s3814_s24  ;;  %p3818_p2 = scmp.lt.u32.totalorder %s3814_s24, %s4562_s13 }
0x1a83   :  { %p3820_p3 = pnand %p3818_p2, %p3815_p1 }
0x1a85   :  { %3823 = shalt.err (!%p3820_p3)
}
0x1a86   :  { %2849 = dma.vmem_to_hbm [thread:$0]  %s2844_s0, 256, %s4562_s13, [#allocation12], %s3878_s25, %s3878_s25, %s3879_s26  }
0x1a87   :  { %s3889_s18 = smov [#allocation13]  }
0x1a88   :  { %s2855_s19 = sshll.u32 %s3889_s18, 4  ;;  %s2856_s19 = int_to_ptr.vmem [resolvable:$true] %s2855_s19 }
0x1a89   :  { %s3824_s5 = scalar_lea.vmem %s2856_s19, 256  ;;  %p3829_p5 = scmp.lt.s32.totalorder %s2856_s19, %s2856_s19 }
0x1a8a   :  { %p3825_p4 = scmp.ne.s32.totalorder %s2856_s19, %s3824_s5  ;;  %p3830_p6 = scmp.lt.s32.totalorder %s3824_s5, %s3824_s5 }
0x1a8c   :  { %p3831_p7 = por %p3830_p6, %p3829_p5 }
0x1a8e   :  { %p3832_p8 = pnand %p3831_p7, %p3825_p4 }
0x1a90   :  { %3835 = shalt.err (!%p3832_p8)
}
0x1a91   :  { %s3836_s2 = scalar_lea.hbm %s4563_s14, 256 }
0x1a92   :  { %p3837_p9 = scmp.ne.s32.totalorder %s4563_s14, %s3836_s2  ;;  %p3840_p10 = scmp.lt.u32.totalorder %s3836_s2, %s4563_s14 }
0x1a94   :  { %p3842_p11 = pnand %p3840_p10, %p3837_p9 }
0x1a96   :  { %3845 = shalt.err (!%p3842_p11)
}
0x1a97   :  { %2861 = dma.vmem_to_hbm [thread:$0]  %s2856_s19, 256, %s4563_s14, [#allocation12], %s3878_s25, %s3878_s25, %s3879_s26  }
0x1a98   :  { %s3890_s30 = smov [#allocation10]  }
0x1a99   :  { %s2831_s23 = sshll.u32 %s3890_s30, 4  ;;  %s2832_s23 = int_to_ptr.vmem [resolvable:$true] %s2831_s23 }
0x1a9a   :  { %s3846_s9 = scalar_lea.vmem %s2832_s23, 1024  ;;  %p3851_p13 = scmp.lt.s32.totalorder %s2832_s23, %s2832_s23 }
0x1a9b   :  { %p3847_p12 = scmp.ne.s32.totalorder %s2832_s23, %s3846_s9  ;;  %p3852_p0 = scmp.lt.s32.totalorder %s3846_s9, %s3846_s9 }
0x1a9d   :  { %p3853_p1 = por %p3852_p0, %p3851_p13 }
0x1a9f   :  { %p3854_p2 = pnand %p3853_p1, %p3847_p12 }
0x1b51   :  { %v3423_v18 = vpop.f32.mrb[34].mxu1 }
0x1b52   :  { %v2807_v20 = vadd.f32 %v3423_v18, %v4483_v53  ;;  %v2801_v21 = vpop.f32.mrb[35].mxu1 }
0x1b53   :  { %v2802_v23 = vadd.f32 %v4483_v53, %v2801_v21 }
0x1b54   :  { %v2817_v24 = vmax.f32 %v2807_v20, 0.0 }
0x1b55   :  { %v2816_v26 = vmax.f32 %v2802_v23, 0.0 }
0x1b56   :  { %2825 = vst [vmem:[#allocation10 + $0x38] sm:$0xff] %v2817_v24 }
0x1b57   :  { %2824 = vst [vmem:[#allocation10 + $0x30] sm:$0xff] %v2816_v26 }
0x1b58   :  { %3857 = shalt.err (!%p3854_p2)
}
0x1b59   :  { %s3858_s0 = scalar_lea.hbm %s4561_s12, 1024 }
0x1b5a   :  { %p3859_p3 = scmp.ne.s32.totalorder %s4561_s12, %s3858_s0  ;;  %p3862_p4 = scmp.lt.u32.totalorder %s3858_s0, %s4561_s12 }
0x1b5c   :  { %p3864_p5 = pnand %p3862_p4, %p3859_p3 }
0x1b5e   :  { %3867 = shalt.err (!%p3864_p5)
}
0x1b5f   :  { %2837 = dma.vmem_to_hbm [thread:$0]  %s2832_s23, 1024, %s4561_s12, [#allocation6], %s3878_s25, %s3878_s25, %s3879_s26  }
0x1b60   :  { %3872 = dma.done.wait [#allocation6], 1024  }
0x1b61   :  { %3873 = vsyncadd [#allocation6], 4294966272 }
0x1b62   :  { %3874 = dma.done.wait [#allocation12], 512  }
0x1b63   :  { %3875 = vsyncadd [#allocation12], 4294966784 }
0x1b64   :  { %2871 = vsyncpa [#allocation5], 1 }
0x1b65   :  { %2872 = vsyncpa [#allocation8], 1 }
0x1b66   :  { %2873 = vsyncpa [#allocation6], 1 }
0x1b67   :  { %2874 = vsyncpa [#allocation12], 1 }

</bundles_post_ra>
